<compile_context>
chip_gen: v7x
topology: tpu7x:2x2x1
jax: 0.10.0
libtpu: 0.0.40
codegen_flags: <defaults>
</compile_context>

<pallas_src>
import functools

import jax
import jax.numpy as jnp
import numpy as np
from jax.experimental import pallas as pl
from jax.experimental.pallas import tpu as pltpu


# ---------------------------------------------------------------------------
# Kernels
# ---------------------------------------------------------------------------
def _upsample_conv_kernel(Ht, Wp, x_ref, w_ref, b_ref, o_ref):
    """Nearest 2x upsample + Conv2d(3x3, padding=1), parity-decomposed row tile.

    x_ref : (1, 1, (Ht+3)*Wp, C_in)   zero-padded, row-flattened NHWC row tile
                                      (includes the 3-row bottom halo)
    w_ref : (4, 4, C_in, co_t)        effective 2x2 weights [2a+b, 2u+v, ci, co]
    b_ref : (1, co_t)                 bias
    o_ref : (1, 1, 4, Ht*Wp, co_t)    per-parity output tile (2 junk cols/row,
                                      sliced off in the wrapper)
    """
    M = Ht * Wp
    acc = [None, None, None, None]               # one f32 accumulator per parity
    # 9 unique shifted slabs keyed by (row shift r = u+a, col shift s = v+b),
    # each loaded exactly once and fed to the MXU for every parity that uses it.
    for r in range(3):
        for s in range(3):
            start = r * Wp + s
            slab = x_ref[0, 0, start:start + M, :]          # (M, C_in) MXU LHS
            for a in range(2):
                u = r - a
                if u < 0 or u > 1:
                    continue
                for b in range(2):
                    v = s - b
                    if v < 0 or v > 1:
                        continue
                    p = 2 * a + b
                    d = jnp.dot(slab, w_ref[p, 2 * u + v],
                                preferred_element_type=jnp.float32)
                    acc[p] = d if acc[p] is None else acc[p] + d
    bias = b_ref[...].astype(jnp.float32)        # (1, co_t) broadcasts in the add
    for p in range(4):
        o_ref[0, 0, p, :, :] = (acc[p] + bias).astype(o_ref.dtype)


def _upsample_only_kernel(x_ref, uw_ref, o_ref):
    """Nearest 2x upsample only (use_conv=False path).

    x_ref : (1, cht, W)      uw_ref : (W, 2W)      o_ref : (1, cht, 4W)
    Columns are duplicated by one exact 0/1 selector matmul on the (idle) MXU;
    rows are duplicated by storing the same slab into the two lane halves of
    the output, whose interleave is a free reshape in the wrapper.
    """
    TW = uw_ref.shape[1]
    up = jnp.dot(x_ref[0], uw_ref[...],
                 preferred_element_type=jnp.float32).astype(o_ref.dtype)
    o_ref[0, :, :TW] = up
    o_ref[0, :, TW:] = up


# ---------------------------------------------------------------------------
# Tile-size heuristics
# ---------------------------------------------------------------------------
def _mxu_is_wide():
    """True on parts with a 256-wide MXU (v6e / v7x); False on v5e."""
    try:
        kind = jax.devices()[0].device_kind.lower()
    except Exception:
        return True
    return not ("v5 lite" in kind or "v5e" in kind or "v5lite" in kind)


def _select_conv_tiles(H, Wp, C, C_out, comp_size, out_size, wide_mxu,
                       row_tile=None):
    """Pick (row_tile Ht, C_out tile co_t) so the double-buffered per-step
    footprint stays well inside v7x's 64 MiB physical VMEM."""
    budget = 22 * 1024 * 1024

    if C_out % 128 == 0:
        co_cands = [256, 128] if (wide_mxu and C_out % 256 == 0) else [128]
    else:
        co_cands = [C_out]

    if row_tile is not None:
        ht_cands = [int(row_tile)]
    else:
        ht_cands = [h for h in (32, 16, 8, 4, 2, 1) if h <= H and H % h == 0]
        if H <= 32 and H not in ht_cands:
            ht_cands = sorted(set(ht_cands + [H]), reverse=True)
        if not ht_cands:
            ht_cands = [1]

    def footprint(Ht, co_t):
        return (2 * 16 * C * co_t * comp_size          # weights (double buffered)
                + 2 * (Ht + 3) * Wp * C * comp_size    # input row tile + halo
                + 2 * 4 * Ht * Wp * co_t * out_size    # output tile
                + 4 * Ht * Wp * co_t * 4               # four f32 accumulators
                + 2 * Ht * Wp * C * 4)                 # slab staging slack

    choices = []
    for co_t in co_cands:
        for Ht in ht_cands:
            if footprint(Ht, co_t) <= budget:
                choices.append((Ht, co_t))
                break
    if not choices:
        return ht_cands[-1], co_cands[-1]
    for Ht, co_t in choices:                     # prefer wide co_t if Ht stays >= 8
        if Ht >= 8 or Ht == ht_cands[0]:
            return Ht, co_t
    return max(choices, key=lambda t: (t[0], t[1]))


def _select_ch_tile(CH, W, itemsize):
    """Plain path: largest multiple-of-8 divisor of C*H whose double-buffered
    in/out tiles stay a few MB (keeps the pipeline deep on every generation)."""
    budget = 6 * 1024 * 1024
    per_row = W * (10 * itemsize + 12)
    best = None
    c = 8
    while c <= min(CH, 4096):
        if CH % c == 0 and c * per_row <= budget:
            best = c
        c += 8
    return best if best is not None else CH


# ---------------------------------------------------------------------------
# Wrapper ("module")
# ---------------------------------------------------------------------------
class Upsample2D:
    """JAX/Pallas port of the PyTorch Upsample2D module (2D, scale factor 2)."""

    def __init__(self, channels, use_conv=False, use_conv_transpose=False,
                 out_channels=None, name='conv', key=None, row_tile=None,
                 mxu_bf16=True):
        # TODO(synk): use_conv_transpose=True (nn.ConvTranspose2d(4,2,1)) path not implemented.
        assert not use_conv_transpose
        if key is None:
            key = jax.random.PRNGKey(0)
        self.channels = channels
        self.out_channels = out_channels or channels
        self.use_conv = use_conv
        self.name = name
        self.row_tile = row_tile            # optional override of the spatial tile
        self.mxu_bf16 = mxu_bf16            # run f32-input matmuls in bf16 (f32 acc)
        self.weight = None
        self.bias = None
        if use_conv:
            kw, kb = jax.random.split(key)
            fan_in = self.channels * 3 * 3
            bound = 1.0 / np.sqrt(fan_in)
            self.weight = jax.random.uniform(
                kw, (self.out_channels, self.channels, 3, 3),
                minval=-bound, maxval=bound, dtype=jnp.float32)
            self.bias = jax.random.uniform(
                kb, (self.out_channels,), minval=-bound, maxval=bound,
                dtype=jnp.float32)

    # ---------------- conv path ----------------
    def _forward_conv(self, x):
        N, C, H, W = x.shape
        C_out = self.out_channels
        Wp = W + 2

        # bf16 matmul operands (full-rate MXU) with f32 accumulation.
        cdt = jnp.bfloat16 if (x.dtype == jnp.bfloat16 or self.mxu_bf16) \
            else jnp.float32
        cs = jnp.dtype(cdt).itemsize
        outs = jnp.dtype(x.dtype).itemsize

        if self.row_tile is not None:
            assert H % int(self.row_tile) == 0
        Ht, co_t = _select_conv_tiles(H, Wp, C, C_out, cs, outs,
                                      _mxu_is_wide(), self.row_tile)
        T = H // Ht
        Rt = (Ht + 3) * Wp            # flat rows per input tile (incl. 3-row halo)
        Mt = Ht * Wp                  # flat output rows per tile (2 junk cols/row)
        n_co = C_out // co_t

        # ---- layout glue: NCHW -> zero-padded NHWC, overlapping flat row tiles ----
        xt = jnp.transpose(x, (0, 2, 3, 1)).astype(cdt)           # (N, H, W, C)
        xpad = jnp.pad(xt, ((0, 0), (1, 2), (1, 1), (0, 0)))      # (N, H+3, Wp, C)
        if T == 1:
            xtiles = xpad.reshape(N, 1, Rt, C)
        else:
            rows = (np.arange(T)[:, None] * Ht
                    + np.arange(Ht + 3)[None, :]).reshape(-1)
            xtiles = jnp.take(xpad, rows, axis=1).reshape(N, T, Rt, C)

        # ---- exact regrouping of the 3x3 taps into 2x2 taps per output parity ----
        wt = jnp.transpose(self.weight.astype(jnp.float32), (2, 3, 1, 0))  # (ky,kx,ci,co)
        G = jnp.array([[[1., 0., 0.], [0., 1., 1.]],
                       [[1., 1., 0.], [0., 0., 1.]]], jnp.float32)         # [a, u, ky]
        w_eff = jnp.einsum('auy,bvx,yxio->abuvio', G, G, wt)               # (2,2,2,2,C,Co)
        w_eff = w_eff.reshape(4, 4, C, C_out).astype(cdt)                  # [2a+b, 2u+v]
        bias = self.bias.astype(jnp.float32).reshape(1, C_out)

        kernel = functools.partial(_upsample_conv_kernel, Ht, Wp)
        cost = pl.CostEstimate(
            flops=int(2 * 16 * N * H * Wp * C * C_out),
            transcendentals=0,
            bytes_accessed=int(n_co * N * T * Rt * C * cs
                               + 16 * C * C_out * cs
                               + C_out * 4
                               + N * 4 * H * Wp * C_out * outs))

        # grid: (C_out tiles, batch, row tiles); co outermost -> each weight tile
        # is DMA'd once; every axis is independent (parallel / megacore friendly).
        out = pl.pallas_call(
            kernel,
            out_shape=jax.ShapeDtypeStruct((N, T, 4, Mt, C_out), x.dtype),
            grid=(n_co, N, T),
            in_specs=[
                pl.BlockSpec((1, 1, Rt, C), lambda c, n, t: (n, t, 0, 0)),
                pl.BlockSpec((4, 4, C, co_t), lambda c, n, t: (0, 0, 0, c)),
                pl.BlockSpec((1, co_t), lambda c, n, t: (0, c)),
            ],
            out_specs=pl.BlockSpec((1, 1, 4, Mt, co_t),
                                   lambda c, n, t: (n, t, 0, 0, c)),
            compiler_params=pltpu.CompilerParams(
                dimension_semantics=("parallel", "parallel", "parallel"),
                vmem_limit_bytes=40 * 1024 * 1024),
            cost_estimate=cost,
        )(xtiles, w_eff, bias)

        # ---- glue: drop junk cols, interleave parities, back to NCHW (one copy) ----
        out = out.reshape(N, T, 2, 2, Ht, Wp, C_out)[:, :, :, :, :, :W, :]
        out = jnp.transpose(out, (0, 6, 1, 4, 2, 5, 3))   # (n, co, t, i, a, j, b)
        return out.reshape(N, C_out, 2 * H, 2 * W)

    # ---------------- upsample-only path ----------------
    def _forward_plain(self, x):
        N, C, H, W = x.shape
        TW = 2 * W
        CH = C * H
        cht = _select_ch_tile(CH, W, jnp.dtype(x.dtype).itemsize)
        n_ch = CH // cht

        xf = x.reshape(N, CH, W)
        # 0/1 column-duplication selector: UW[w, q] = 1 iff w == q // 2  (exact)
        uw = (jnp.arange(W)[:, None] == (jnp.arange(TW)[None, :] // 2)).astype(x.dtype)

        cost = pl.CostEstimate(
            flops=int(2 * N * CH * W * TW),
            transcendentals=0,
            bytes_accessed=int((N * CH * W + W * TW + N * CH * 2 * TW)
                               * jnp.dtype(x.dtype).itemsize))
        out = pl.pallas_call(
            _upsample_only_kernel,
            out_shape=jax.ShapeDtypeStruct((N, CH, 2 * TW), x.dtype),
            grid=(N, n_ch),
            in_specs=[pl.BlockSpec((1, cht, W), lambda n, h: (n, h, 0)),
                      pl.BlockSpec((W, TW), lambda n, h: (0, 0))],
            out_specs=pl.BlockSpec((1, cht, 2 * TW), lambda n, h: (n, h, 0)),
            compiler_params=pltpu.CompilerParams(
                dimension_semantics=("parallel", "parallel"),
                vmem_limit_bytes=32 * 1024 * 1024),
            cost_estimate=cost,
        )(xf, uw)

        # (N, C*H, 2*2W) -> (N, C, 2H, 2W): pure contiguous reshape (no transpose).
        return out.reshape(N, C, 2 * H, TW)

    def __call__(self, x, output_size=None):
        # TODO(synk): output_size != None (arbitrary-size nearest resize) not implemented.
        assert output_size is None
        N, C, H, W = x.shape
        assert C == self.channels
        if self.use_conv:
            return self._forward_conv(x)
        return self._forward_plain(x)


# ---------------------------------------------------------------------------
# Pure-JAX reference (for verification only)
# ---------------------------------------------------------------------------
def _ref_forward(x, weight, bias, use_conv):
    up = jnp.repeat(jnp.repeat(x.astype(jnp.float32), 2, axis=2), 2, axis=3)
    if not use_conv:
        return up.astype(x.dtype)
    out = jax.lax.conv_general_dilated(
        up, weight, window_strides=(1, 1), padding=((1, 1), (1, 1)),
        dimension_numbers=('NCHW', 'OIHW', 'NCHW'),
        precision=jax.lax.Precision.HIGHEST)
    return (out + bias[None, :, None, None]).astype(x.dtype)


if __name__ == "__main__":
    key = jax.random.PRNGKey(0)
    kx, k1, k2 = jax.random.split(key, 3)

    N, C, H, W = 2, 4, 16, 16
    x = jax.random.normal(kx, (N, C, H, W), dtype=jnp.float32)

    # use_conv=True path (fused upsample + 3x3 conv), auto tiling (single row tile)
    mod = Upsample2D(channels=C, use_conv=True, key=k1)
    out = jax.block_until_ready(mod(x))
    ref = _ref_forward(x, mod.weight, mod.bias, use_conv=True)
    assert out.shape == (N, C, 2 * H, 2 * W), out.shape
    assert out.dtype == x.dtype
    err = float(jnp.max(jnp.abs(out - ref)))
    assert err < 5e-2, f"conv path mismatch, max abs err = {err}"

    # use_conv=True path with forced row tiling (T=2) and different out_channels
    mod2 = Upsample2D(channels=C, use_conv=True, out_channels=8, key=k2,
                      row_tile=8)
    out2 = jax.block_until_ready(mod2(x))
    ref2 = _ref_forward(x, mod2.weight, mod2.bias, use_conv=True)
    assert out2.shape == (N, 8, 2 * H, 2 * W), out2.shape
    err2 = float(jnp.max(jnp.abs(out2 - ref2)))
    assert err2 < 5e-2, f"tiled conv path mismatch, max abs err = {err2}"

    # use_conv=False path (pure nearest 2x upsample, exact)
    mod3 = Upsample2D(channels=C, use_conv=False)
    out3 = jax.block_until_ready(mod3(x))
    ref3 = _ref_forward(x, None, None, use_conv=False)
    assert out3.shape == (N, C, 2 * H, 2 * W), out3.shape
    err3 = float(jnp.max(jnp.abs(out3 - ref3)))
    assert err3 < 1e-6, f"upsample path mismatch, max abs err = {err3}"

    print("KERNEL_OK")
</pallas_src>

<mosaic_0001>
module attributes {stable_mosaic.version = 11 : i64} {
  func.func @_upsample_conv_kernel(%arg0: i32, %arg1: i32, %arg2: i32, %arg3: memref<1x1x342x4xbf16, #tpu.memory_space<vmem>>, %arg4: memref<4x4x4x4xbf16, #tpu.memory_space<vmem>>, %arg5: memref<1x4xf32, #tpu.memory_space<vmem>>, %arg6: memref<1x1x4x288x4xf32, #tpu.memory_space<vmem>>) attributes {dimension_semantics = [#tpu.dimension_semantics<parallel>, #tpu.dimension_semantics<parallel>, #tpu.dimension_semantics<parallel>], iteration_bounds = array<i64: 1, 2, 1>, scalar_prefetch = 0 : i64, scratch_operands = 0 : i64, tpu.core_type = #tpu.core_type<tc>, window_params = [{transform_indices = @transform_0, window_bounds = array<i64: 1, 1, 342, 4>}, {transform_indices = @transform_1, window_bounds = array<i64: 4, 4, 4, 4>}, {transform_indices = @transform_2, window_bounds = array<i64: 1, 4>}, {transform_indices = @transform_3, window_bounds = array<i64: 1, 1, 4, 288, 4>}]} {
    %c0 = arith.constant 0 : index
    %c0_0 = arith.constant 0 : index
    %c0_1 = arith.constant 0 : index
    %c0_2 = arith.constant 0 : index
    %0 = vector.load %arg3[%c0, %c0_0, %c0_1, %c0_2] : memref<1x1x342x4xbf16, #tpu.memory_space<vmem>>, vector<1x1x288x4xbf16>
    %1 = vector.shape_cast %0 : vector<1x1x288x4xbf16> to vector<288x4xbf16>
    %c0_3 = arith.constant 0 : index
    %c0_4 = arith.constant 0 : index
    %c0_5 = arith.constant 0 : index
    %c0_6 = arith.constant 0 : index
    %2 = vector.load %arg4[%c0_3, %c0_4, %c0_5, %c0_6] : memref<4x4x4x4xbf16, #tpu.memory_space<vmem>>, vector<1x1x4x4xbf16>
    %3 = vector.shape_cast %2 : vector<1x1x4x4xbf16> to vector<4x4xbf16>
    %cst = arith.constant dense<0.000000e+00> : vector<288x4xf32>
    %4 = tpu.matmul %1, %3, %cst {dimension_numbers = #tpu.dot_dimension_numbers<[1], [0], [0], [1], [0, 0, 1, 1], [], []>} : vector<288x4xbf16>, vector<4x4xbf16>, vector<288x4xf32> -> vector<288x4xf32>
    %c0_7 = arith.constant 0 : index
    %c0_8 = arith.constant 0 : index
    %c1 = arith.constant 1 : index
    %c0_9 = arith.constant 0 : index
    %5 = vector.load %arg3[%c0_7, %c0_8, %c1, %c0_9] : memref<1x1x342x4xbf16, #tpu.memory_space<vmem>>, vector<1x1x288x4xbf16>
    %6 = vector.shape_cast %5 : vector<1x1x288x4xbf16> to vector<288x4xbf16>
    %c0_10 = arith.constant 0 : index
    %c1_11 = arith.constant 1 : index
    %c0_12 = arith.constant 0 : index
    %c0_13 = arith.constant 0 : index
    %7 = vector.load %arg4[%c0_10, %c1_11, %c0_12, %c0_13] : memref<4x4x4x4xbf16, #tpu.memory_space<vmem>>, vector<1x1x4x4xbf16>
    %8 = vector.shape_cast %7 : vector<1x1x4x4xbf16> to vector<4x4xbf16>
    %cst_14 = arith.constant dense<0.000000e+00> : vector<288x4xf32>
    %9 = tpu.matmul %6, %8, %cst_14 {dimension_numbers = #tpu.dot_dimension_numbers<[1], [0], [0], [1], [0, 0, 1, 1], [], []>} : vector<288x4xbf16>, vector<4x4xbf16>, vector<288x4xf32> -> vector<288x4xf32>
    %10 = arith.addf %4, %9 : vector<288x4xf32>
    %c1_15 = arith.constant 1 : index
    %c0_16 = arith.constant 0 : index
    %c0_17 = arith.constant 0 : index
    %c0_18 = arith.constant 0 : index
    %11 = vector.load %arg4[%c1_15, %c0_16, %c0_17, %c0_18] : memref<4x4x4x4xbf16, #tpu.memory_space<vmem>>, vector<1x1x4x4xbf16>
    %12 = vector.shape_cast %11 : vector<1x1x4x4xbf16> to vector<4x4xbf16>
    %cst_19 = arith.constant dense<0.000000e+00> : vector<288x4xf32>
    %13 = tpu.matmul %6, %12, %cst_19 {dimension_numbers = #tpu.dot_dimension_numbers<[1], [0], [0], [1], [0, 0, 1, 1], [], []>} : vector<288x4xbf16>, vector<4x4xbf16>, vector<288x4xf32> -> vector<288x4xf32>
    %c0_20 = arith.constant 0 : index
    %c0_21 = arith.constant 0 : index
    %c2 = arith.constant 2 : index
    %c0_22 = arith.constant 0 : index
    %14 = vector.load %arg3[%c0_20, %c0_21, %c2, %c0_22] : memref<1x1x342x4xbf16, #tpu.memory_space<vmem>>, vector<1x1x288x4xbf16>
    %15 = vector.shape_cast %14 : vector<1x1x288x4xbf16> to vector<288x4xbf16>
    %c1_23 = arith.constant 1 : index
    %c1_24 = arith.constant 1 : index
    %c0_25 = arith.constant 0 : index
    %c0_26 = arith.constant 0 : index
    %16 = vector.load %arg4[%c1_23, %c1_24, %c0_25, %c0_26] : memref<4x4x4x4xbf16, #tpu.memory_space<vmem>>, vector<1x1x4x4xbf16>
    %17 = vector.shape_cast %16 : vector<1x1x4x4xbf16> to vector<4x4xbf16>
    %cst_27 = arith.constant dense<0.000000e+00> : vector<288x4xf32>
    %18 = tpu.matmul %15, %17, %cst_27 {dimension_numbers = #tpu.dot_dimension_numbers<[1], [0], [0], [1], [0, 0, 1, 1], [], []>} : vector<288x4xbf16>, vector<4x4xbf16>, vector<288x4xf32> -> vector<288x4xf32>
    %19 = arith.addf %13, %18 : vector<288x4xf32>
    %c0_28 = arith.constant 0 : index
    %c0_29 = arith.constant 0 : index
    %c18 = arith.constant 18 : index
    %c0_30 = arith.constant 0 : index
    %20 = vector.load %arg3[%c0_28, %c0_29, %c18, %c0_30] : memref<1x1x342x4xbf16, #tpu.memory_space<vmem>>, vector<1x1x288x4xbf16>
    %21 = vector.shape_cast %20 : vector<1x1x288x4xbf16> to vector<288x4xbf16>
    %c0_31 = arith.constant 0 : index
    %c2_32 = arith.constant 2 : index
    %c0_33 = arith.constant 0 : index
    %c0_34 = arith.constant 0 : index
    %22 = vector.load %arg4[%c0_31, %c2_32, %c0_33, %c0_34] : memref<4x4x4x4xbf16, #tpu.memory_space<vmem>>, vector<1x1x4x4xbf16>
    %23 = vector.shape_cast %22 : vector<1x1x4x4xbf16> to vector<4x4xbf16>
    %cst_35 = arith.constant dense<0.000000e+00> : vector<288x4xf32>
    %24 = tpu.matmul %21, %23, %cst_35 {dimension_numbers = #tpu.dot_dimension_numbers<[1], [0], [0], [1], [0, 0, 1, 1], [], []>} : vector<288x4xbf16>, vector<4x4xbf16>, vector<288x4xf32> -> vector<288x4xf32>
    %25 = arith.addf %10, %24 : vector<288x4xf32>
    %c2_36 = arith.constant 2 : index
    %c0_37 = arith.constant 0 : index
    %c0_38 = arith.constant 0 : index
    %c0_39 = arith.constant 0 : index
    %26 = vector.load %arg4[%c2_36, %c0_37, %c0_38, %c0_39] : memref<4x4x4x4xbf16, #tpu.memory_space<vmem>>, vector<1x1x4x4xbf16>
    %27 = vector.shape_cast %26 : vector<1x1x4x4xbf16> to vector<4x4xbf16>
    %cst_40 = arith.constant dense<0.000000e+00> : vector<288x4xf32>
    %28 = tpu.matmul %21, %27, %cst_40 {dimension_numbers = #tpu.dot_dimension_numbers<[1], [0], [0], [1], [0, 0, 1, 1], [], []>} : vector<288x4xbf16>, vector<4x4xbf16>, vector<288x4xf32> -> vector<288x4xf32>
    %c0_41 = arith.constant 0 : index
    %c0_42 = arith.constant 0 : index
    %c19 = arith.constant 19 : index
    %c0_43 = arith.constant 0 : index
    %29 = vector.load %arg3[%c0_41, %c0_42, %c19, %c0_43] : memref<1x1x342x4xbf16, #tpu.memory_space<vmem>>, vector<1x1x288x4xbf16>
    %30 = vector.shape_cast %29 : vector<1x1x288x4xbf16> to vector<288x4xbf16>
    %c0_44 = arith.constant 0 : index
    %c3 = arith.constant 3 : index
    %c0_45 = arith.constant 0 : index
    %c0_46 = arith.constant 0 : index
    %31 = vector.load %arg4[%c0_44, %c3, %c0_45, %c0_46] : memref<4x4x4x4xbf16, #tpu.memory_space<vmem>>, vector<1x1x4x4xbf16>
    %32 = vector.shape_cast %31 : vector<1x1x4x4xbf16> to vector<4x4xbf16>
    %cst_47 = arith.constant dense<0.000000e+00> : vector<288x4xf32>
    %33 = tpu.matmul %30, %32, %cst_47 {dimension_numbers = #tpu.dot_dimension_numbers<[1], [0], [0], [1], [0, 0, 1, 1], [], []>} : vector<288x4xbf16>, vector<4x4xbf16>, vector<288x4xf32> -> vector<288x4xf32>
    %34 = arith.addf %25, %33 : vector<288x4xf32>
    %c1_48 = arith.constant 1 : index
    %c2_49 = arith.constant 2 : index
    %c0_50 = arith.constant 0 : index
    %c0_51 = arith.constant 0 : index
    %35 = vector.load %arg4[%c1_48, %c2_49, %c0_50, %c0_51] : memref<4x4x4x4xbf16, #tpu.memory_space<vmem>>, vector<1x1x4x4xbf16>
    %36 = vector.shape_cast %35 : vector<1x1x4x4xbf16> to vector<4x4xbf16>
    %cst_52 = arith.constant dense<0.000000e+00> : vector<288x4xf32>
    %37 = tpu.matmul %30, %36, %cst_52 {dimension_numbers = #tpu.dot_dimension_numbers<[1], [0], [0], [1], [0, 0, 1, 1], [], []>} : vector<288x4xbf16>, vector<4x4xbf16>, vector<288x4xf32> -> vector<288x4xf32>
    %38 = arith.addf %19, %37 : vector<288x4xf32>
    %c2_53 = arith.constant 2 : index
    %c1_54 = arith.constant 1 : index
    %c0_55 = arith.constant 0 : index
    %c0_56 = arith.constant 0 : index
    %39 = vector.load %arg4[%c2_53, %c1_54, %c0_55, %c0_56] : memref<4x4x4x4xbf16, #tpu.memory_space<vmem>>, vector<1x1x4x4xbf16>
    %40 = vector.shape_cast %39 : vector<1x1x4x4xbf16> to vector<4x4xbf16>
    %cst_57 = arith.constant dense<0.000000e+00> : vector<288x4xf32>
    %41 = tpu.matmul %30, %40, %cst_57 {dimension_numbers = #tpu.dot_dimension_numbers<[1], [0], [0], [1], [0, 0, 1, 1], [], []>} : vector<288x4xbf16>, vector<4x4xbf16>, vector<288x4xf32> -> vector<288x4xf32>
    %42 = arith.addf %28, %41 : vector<288x4xf32>
    %c3_58 = arith.constant 3 : index
    %c0_59 = arith.constant 0 : index
    %c0_60 = arith.constant 0 : index
    %c0_61 = arith.constant 0 : index
    %43 = vector.load %arg4[%c3_58, %c0_59, %c0_60, %c0_61] : memref<4x4x4x4xbf16, #tpu.memory_space<vmem>>, vector<1x1x4x4xbf16>
    %44 = vector.shape_cast %43 : vector<1x1x4x4xbf16> to vector<4x4xbf16>
    %cst_62 = arith.constant dense<0.000000e+00> : vector<288x4xf32>
    %45 = tpu.matmul %30, %44, %cst_62 {dimension_numbers = #tpu.dot_dimension_numbers<[1], [0], [0], [1], [0, 0, 1, 1], [], []>} : vector<288x4xbf16>, vector<4x4xbf16>, vector<288x4xf32> -> vector<288x4xf32>
    %c0_63 = arith.constant 0 : index
    %c0_64 = arith.constant 0 : index
    %c20 = arith.constant 20 : index
    %c0_65 = arith.constant 0 : index
    %46 = vector.load %arg3[%c0_63, %c0_64, %c20, %c0_65] : memref<1x1x342x4xbf16, #tpu.memory_space<vmem>>, vector<1x1x288x4xbf16>
    %47 = vector.shape_cast %46 : vector<1x1x288x4xbf16> to vector<288x4xbf16>
    %c1_66 = arith.constant 1 : index
    %c3_67 = arith.constant 3 : index
    %c0_68 = arith.constant 0 : index
    %c0_69 = arith.constant 0 : index
    %48 = vector.load %arg4[%c1_66, %c3_67, %c0_68, %c0_69] : memref<4x4x4x4xbf16, #tpu.memory_space<vmem>>, vector<1x1x4x4xbf16>
    %49 = vector.shape_cast %48 : vector<1x1x4x4xbf16> to vector<4x4xbf16>
    %cst_70 = arith.constant dense<0.000000e+00> : vector<288x4xf32>
    %50 = tpu.matmul %47, %49, %cst_70 {dimension_numbers = #tpu.dot_dimension_numbers<[1], [0], [0], [1], [0, 0, 1, 1], [], []>} : vector<288x4xbf16>, vector<4x4xbf16>, vector<288x4xf32> -> vector<288x4xf32>
    %51 = arith.addf %38, %50 : vector<288x4xf32>
    %c3_71 = arith.constant 3 : index
    %c1_72 = arith.constant 1 : index
    %c0_73 = arith.constant 0 : index
    %c0_74 = arith.constant 0 : index
    %52 = vector.load %arg4[%c3_71, %c1_72, %c0_73, %c0_74] : memref<4x4x4x4xbf16, #tpu.memory_space<vmem>>, vector<1x1x4x4xbf16>
    %53 = vector.shape_cast %52 : vector<1x1x4x4xbf16> to vector<4x4xbf16>
    %cst_75 = arith.constant dense<0.000000e+00> : vector<288x4xf32>
    %54 = tpu.matmul %47, %53, %cst_75 {dimension_numbers = #tpu.dot_dimension_numbers<[1], [0], [0], [1], [0, 0, 1, 1], [], []>} : vector<288x4xbf16>, vector<4x4xbf16>, vector<288x4xf32> -> vector<288x4xf32>
    %55 = arith.addf %45, %54 : vector<288x4xf32>
    %c0_76 = arith.constant 0 : index
    %c0_77 = arith.constant 0 : index
    %c36 = arith.constant 36 : index
    %c0_78 = arith.constant 0 : index
    %56 = vector.load %arg3[%c0_76, %c0_77, %c36, %c0_78] : memref<1x1x342x4xbf16, #tpu.memory_space<vmem>>, vector<1x1x288x4xbf16>
    %57 = vector.shape_cast %56 : vector<1x1x288x4xbf16> to vector<288x4xbf16>
    %c2_79 = arith.constant 2 : index
    %c2_80 = arith.constant 2 : index
    %c0_81 = arith.constant 0 : index
    %c0_82 = arith.constant 0 : index
    %58 = vector.load %arg4[%c2_79, %c2_80, %c0_81, %c0_82] : memref<4x4x4x4xbf16, #tpu.memory_space<vmem>>, vector<1x1x4x4xbf16>
    %59 = vector.shape_cast %58 : vector<1x1x4x4xbf16> to vector<4x4xbf16>
    %cst_83 = arith.constant dense<0.000000e+00> : vector<288x4xf32>
    %60 = tpu.matmul %57, %59, %cst_83 {dimension_numbers = #tpu.dot_dimension_numbers<[1], [0], [0], [1], [0, 0, 1, 1], [], []>} : vector<288x4xbf16>, vector<4x4xbf16>, vector<288x4xf32> -> vector<288x4xf32>
    %61 = arith.addf %42, %60 : vector<288x4xf32>
    %c0_84 = arith.constant 0 : index
    %c0_85 = arith.constant 0 : index
    %c37 = arith.constant 37 : index
    %c0_86 = arith.constant 0 : index
    %62 = vector.load %arg3[%c0_84, %c0_85, %c37, %c0_86] : memref<1x1x342x4xbf16, #tpu.memory_space<vmem>>, vector<1x1x288x4xbf16>
    %63 = vector.shape_cast %62 : vector<1x1x288x4xbf16> to vector<288x4xbf16>
    %c2_87 = arith.constant 2 : index
    %c3_88 = arith.constant 3 : index
    %c0_89 = arith.constant 0 : index
    %c0_90 = arith.constant 0 : index
    %64 = vector.load %arg4[%c2_87, %c3_88, %c0_89, %c0_90] : memref<4x4x4x4xbf16, #tpu.memory_space<vmem>>, vector<1x1x4x4xbf16>
    %65 = vector.shape_cast %64 : vector<1x1x4x4xbf16> to vector<4x4xbf16>
    %cst_91 = arith.constant dense<0.000000e+00> : vector<288x4xf32>
    %66 = tpu.matmul %63, %65, %cst_91 {dimension_numbers = #tpu.dot_dimension_numbers<[1], [0], [0], [1], [0, 0, 1, 1], [], []>} : vector<288x4xbf16>, vector<4x4xbf16>, vector<288x4xf32> -> vector<288x4xf32>
    %67 = arith.addf %61, %66 : vector<288x4xf32>
    %c3_92 = arith.constant 3 : index
    %c2_93 = arith.constant 2 : index
    %c0_94 = arith.constant 0 : index
    %c0_95 = arith.constant 0 : index
    %68 = vector.load %arg4[%c3_92, %c2_93, %c0_94, %c0_95] : memref<4x4x4x4xbf16, #tpu.memory_space<vmem>>, vector<1x1x4x4xbf16>
    %69 = vector.shape_cast %68 : vector<1x1x4x4xbf16> to vector<4x4xbf16>
    %cst_96 = arith.constant dense<0.000000e+00> : vector<288x4xf32>
    %70 = tpu.matmul %63, %69, %cst_96 {dimension_numbers = #tpu.dot_dimension_numbers<[1], [0], [0], [1], [0, 0, 1, 1], [], []>} : vector<288x4xbf16>, vector<4x4xbf16>, vector<288x4xf32> -> vector<288x4xf32>
    %71 = arith.addf %55, %70 : vector<288x4xf32>
    %c0_97 = arith.constant 0 : index
    %c0_98 = arith.constant 0 : index
    %c38 = arith.constant 38 : index
    %c0_99 = arith.constant 0 : index
    %72 = vector.load %arg3[%c0_97, %c0_98, %c38, %c0_99] : memref<1x1x342x4xbf16, #tpu.memory_space<vmem>>, vector<1x1x288x4xbf16>
    %73 = vector.shape_cast %72 : vector<1x1x288x4xbf16> to vector<288x4xbf16>
    %c3_100 = arith.constant 3 : index
    %c3_101 = arith.constant 3 : index
    %c0_102 = arith.constant 0 : index
    %c0_103 = arith.constant 0 : index
    %74 = vector.load %arg4[%c3_100, %c3_101, %c0_102, %c0_103] : memref<4x4x4x4xbf16, #tpu.memory_space<vmem>>, vector<1x1x4x4xbf16>
    %75 = vector.shape_cast %74 : vector<1x1x4x4xbf16> to vector<4x4xbf16>
    %cst_104 = arith.constant dense<0.000000e+00> : vector<288x4xf32>
    %76 = tpu.matmul %73, %75, %cst_104 {dimension_numbers = #tpu.dot_dimension_numbers<[1], [0], [0], [1], [0, 0, 1, 1], [], []>} : vector<288x4xbf16>, vector<4x4xbf16>, vector<288x4xf32> -> vector<288x4xf32>
    %77 = arith.addf %71, %76 : vector<288x4xf32>
    %c0_105 = arith.constant 0 : index
    %c0_106 = arith.constant 0 : index
    %78 = vector.load %arg5[%c0_105, %c0_106] : memref<1x4xf32, #tpu.memory_space<vmem>>, vector<1x4xf32>
    %79 = vector.broadcast %78 : vector<1x4xf32> to vector<288x4xf32>
    %80 = arith.addf %34, %79 : vector<288x4xf32>
    %c0_107 = arith.constant 0 : index
    %c0_108 = arith.constant 0 : index
    %c0_109 = arith.constant 0 : index
    %c0_110 = arith.constant 0 : index
    %c0_111 = arith.constant 0 : index
    %81 = vector.load %arg6[%c0_107, %c0_108, %c0_109, %c0_110, %c0_111] : memref<1x1x4x288x4xf32, #tpu.memory_space<vmem>>, vector<1x1x1x288x4xf32>
    %82 = vector.shape_cast %81 : vector<1x1x1x288x4xf32> to vector<288x4xf32>
    %83 = vector.shape_cast %80 : vector<288x4xf32> to vector<1x1x1x288x4xf32>
    tpu.vector_store %arg6[%c0_107, %c0_108, %c0_109, %c0_110, %c0_111], %83 {strides = array<i32>} : memref<1x1x4x288x4xf32, #tpu.memory_space<vmem>>, vector<1x1x1x288x4xf32>,
    %84 = vector.broadcast %78 : vector<1x4xf32> to vector<288x4xf32>
    %85 = arith.addf %51, %84 : vector<288x4xf32>
    %c0_112 = arith.constant 0 : index
    %c0_113 = arith.constant 0 : index
    %c1_114 = arith.constant 1 : index
    %c0_115 = arith.constant 0 : index
    %c0_116 = arith.constant 0 : index
    %86 = vector.load %arg6[%c0_112, %c0_113, %c1_114, %c0_115, %c0_116] : memref<1x1x4x288x4xf32, #tpu.memory_space<vmem>>, vector<1x1x1x288x4xf32>
    %87 = vector.shape_cast %86 : vector<1x1x1x288x4xf32> to vector<288x4xf32>
    %88 = vector.shape_cast %85 : vector<288x4xf32> to vector<1x1x1x288x4xf32>
    tpu.vector_store %arg6[%c0_112, %c0_113, %c1_114, %c0_115, %c0_116], %88 {strides = array<i32>} : memref<1x1x4x288x4xf32, #tpu.memory_space<vmem>>, vector<1x1x1x288x4xf32>,
    %89 = vector.broadcast %78 : vector<1x4xf32> to vector<288x4xf32>
    %90 = arith.addf %67, %89 : vector<288x4xf32>
    %c0_117 = arith.constant 0 : index
    %c0_118 = arith.constant 0 : index
    %c2_119 = arith.constant 2 : index
    %c0_120 = arith.constant 0 : index
    %c0_121 = arith.constant 0 : index
    %91 = vector.load %arg6[%c0_117, %c0_118, %c2_119, %c0_120, %c0_121] : memref<1x1x4x288x4xf32, #tpu.memory_space<vmem>>, vector<1x1x1x288x4xf32>
    %92 = vector.shape_cast %91 : vector<1x1x1x288x4xf32> to vector<288x4xf32>
    %93 = vector.shape_cast %90 : vector<288x4xf32> to vector<1x1x1x288x4xf32>
    tpu.vector_store %arg6[%c0_117, %c0_118, %c2_119, %c0_120, %c0_121], %93 {strides = array<i32>} : memref<1x1x4x288x4xf32, #tpu.memory_space<vmem>>, vector<1x1x1x288x4xf32>,
    %94 = vector.broadcast %78 : vector<1x4xf32> to vector<288x4xf32>
    %95 = arith.addf %77, %94 : vector<288x4xf32>
    %c0_122 = arith.constant 0 : index
    %c0_123 = arith.constant 0 : index
    %c3_124 = arith.constant 3 : index
    %c0_125 = arith.constant 0 : index
    %c0_126 = arith.constant 0 : index
    %96 = vector.load %arg6[%c0_122, %c0_123, %c3_124, %c0_125, %c0_126] : memref<1x1x4x288x4xf32, #tpu.memory_space<vmem>>, vector<1x1x1x288x4xf32>
    %97 = vector.shape_cast %96 : vector<1x1x1x288x4xf32> to vector<288x4xf32>
    %98 = vector.shape_cast %95 : vector<288x4xf32> to vector<1x1x1x288x4xf32>
    tpu.vector_store %arg6[%c0_122, %c0_123, %c3_124, %c0_125, %c0_126], %98 {strides = array<i32>} : memref<1x1x4x288x4xf32, #tpu.memory_space<vmem>>, vector<1x1x1x288x4xf32>,
    return
  }
  func.func @transform_0(%arg0: i32, %arg1: i32, %arg2: i32) -> (i32, i32, i32, i32) {
    %c0_i32 = arith.constant 0 : i32
    %c0_i32_0 = arith.constant 0 : i32
    %c0_i32_1 = arith.constant 0 : i32
    return %arg1, %arg2, %c0_i32, %c0_i32_0 : i32, i32, i32, i32
  }
  func.func @transform_1(%arg0: i32, %arg1: i32, %arg2: i32) -> (i32, i32, i32, i32) {
    %c0_i32 = arith.constant 0 : i32
    %c0_i32_0 = arith.constant 0 : i32
    %c0_i32_1 = arith.constant 0 : i32
    %c0_i32_2 = arith.constant 0 : i32
    return %c0_i32, %c0_i32_0, %c0_i32_1, %arg0 : i32, i32, i32, i32
  }
  func.func @transform_2(%arg0: i32, %arg1: i32, %arg2: i32) -> (i32, i32) {
    %c0_i32 = arith.constant 0 : i32
    %c0_i32_0 = arith.constant 0 : i32
    return %c0_i32, %arg0 : i32, i32
  }
  func.func @transform_3(%arg0: i32, %arg1: i32, %arg2: i32) -> (i32, i32, i32, i32, i32) {
    %c0_i32 = arith.constant 0 : i32
    %c0_i32_0 = arith.constant 0 : i32
    %c0_i32_1 = arith.constant 0 : i32
    return %arg1, %arg2, %c0_i32, %c0_i32_0, %arg0 : i32, i32, i32, i32, i32
  }
}

</mosaic_0001>

<bundles_post_ra>
// kernel: tpu_custom_call.1
= control target key start
LH: loop header
LB: loop body
LE: loop exit
PB: predicated region body
PF: predicated region fallthrough
CT: control target
= control target key end

     0   :  { %8 = vsyncpa [#allocation3], 0  ;;  %s9320_s0 = inlined_call_operand.vmem [shape: bf16[2,1,342,4], index: 0, kind: input, shape index: {}]   ;;  %s9321_s1 = inlined_call_operand.hbm [shape: bf16[4,4,4,4], index: 1, kind: input, shape index: {}]   ;;  %s9322_s2 = inlined_call_operand.hbm [shape: f32[1,4], index: 2, kind: input, shape index: {}]   ;;  %s9323_s3 = inlined_call_operand.vmem [shape: f32[2,1,4,288,4], index: 3, kind: output, shape index: {}]  }
   0x1   :  { %9 = vsyncpa [#allocation5], 0  ;;  %s7508_s12 = smov 0   ;;  %s7510_s13 = smov 0  }
   0x2   :  { %s7512_s14 = smov 0  }
   0x3 LB: > { %s5453_s15 = sadd.s32 4294967295, %s7482_s14   ;;  %s30_s16 = sadd.s32 1, %s7478_s13  ;;  %s7482_s14 = sphi %s7512_s14, %s15_s14   ;;  %s7478_s13 = sphi %s7510_s13, %s9339_s13   ;;  %s7474_s12 = sphi %s7508_s12, %s9338_s12  }
   0x4   : > { %p32_p0 = scmp.ge.s32.totalorder %s30_s16, 2  ;;  %p5455_p1 = scmp.ge.s32.totalorder %s7482_s14, 1 }
   0x5   : > { %p149_p2 = scmp.lt.s32.totalorder %s7482_s14, 3  ;;  %p7533_p4 = scmp.eq.s32.totalorder %s5453_s15, 0 }
   0x6   : > { %s9341_s16 = smov (%p32_p0, %s30_s16), 0  ;;  %s7484_s19 = smov [#allocation2]  }
   0x7   : > { %p7529_p3 = pnand %p5455_p1, %p149_p2  ;;  %s163_s20 = sshll.u32 %s7484_s19, 4  ;;  %s164_s20 = int_to_ptr.vmem [resolvable:$true] %s163_s20 }
   0x8   : > { %s9330_s18 = scalar_select %p7533_p4, 1, 0 }
   0x9   : > { %s9329_s17 = scalar_select %p7529_p3, 1, 0 }
   0xa   : > { %p7295_p5 = pneg %p7529_p3  ;;  %s7485_s22 = smov [#allocation4]  }
   0xb   : > { %s179_s23 = sshll.u32 %s7485_s22, 4  ;;  %s7396_s26 = scalar_lea.hbm %s9321_s1, 512  ;;  %s7545_s23 = int_to_ptr.vmem [resolvable:$true] %s179_s23 }
   0xc   : > { %p7541_p6 = pnand %p7533_p4, %p7295_p5  ;;  %p7397_p7 = scmp.ne.s32.totalorder %s9321_s1, %s7396_s26 }
   0xd   : > { %p7403_p11 = scmp.lt.u32.totalorder %s7396_s26, %s9321_s1 }
   0xe   : > { %p7398_p8 = pneg %p7541_p6 }
  0x10   : > { %p7399_p9 = pnand %p7398_p8, %p7397_p7 }
  0x12   : > { %p7400_p10 = pneg %p7399_p9 }
  0x14   : > { %p7405_p12 = pnand %p7403_p11, %p7400_p10 }
  0x16   : > { %7408 = shalt.err (!%p7405_p12)
}
  0x17   : > { %s7409_s4 = scalar_lea.vmem %s164_s20, 512  ;;  %p7417_p2 = scmp.lt.s32.totalorder %s164_s20, %s164_s20 }
  0x18   : > { %p7410_p13 = scmp.ne.s32.totalorder %s164_s20, %s7409_s4  ;;  %p7418_p5 = scmp.lt.s32.totalorder %s7409_s4, %s7409_s4 }
  0x1a   : > { %p7412_p0 = pnand %p7410_p13, %p7398_p8  ;;  %p7419_p4 = por %p7418_p5, %p7417_p2 }
  0x1c   : > { %p7413_p1 = pneg %p7412_p0 }
  0x1e   : > { %p7420_p3 = pnand %p7419_p4, %p7413_p1 }
  0x20   : > { %7423 = shalt.err (!%p7420_p3)
}
  0x21   : > { %s7486_s5 = smov 32   ;;  %s7487_s6 = smov 2  }
  0x22   : > { %7298 = dma.hbm_to_vmem [thread:$0]  (!%p7541_p6), %s9321_s1, 512, %s164_s20, [#allocation3], %s7486_s5, %s7486_s5, %s7487_s6  }
  0x23   : > { %s7424_s11 = scalar_lea.hbm %s9322_s2, 16 }
  0x24   : > { %p7425_p7 = scmp.ne.s32.totalorder %s9322_s2, %s7424_s11  ;;  %p7431_p9 = scmp.lt.u32.totalorder %s7424_s11, %s9322_s2 }
  0x26   : > { %p7427_p3 = pnand %p7425_p7, %p7398_p8 }
  0x28   : > { %p7428_p4 = pneg %p7427_p3 }
  0x2a   : > { %p7433_p10 = pnand %p7431_p9, %p7428_p4 }
  0x2c   : > { %7436 = shalt.err (!%p7433_p10)
}
  0x2d   : > { %s7437_s20 = scalar_lea.vmem %s7545_s23, 16  ;;  %s7444_s25 = scalar_lea.vmem %s7545_s23, 32 }
  0x2e   : > { %p7438_p11 = scmp.ne.s32.totalorder %s7545_s23, %s7437_s20  ;;  %p7445_p0 = scmp.lt.s32.totalorder %s7545_s23, %s7545_s23 }
  0x2f   : > { %p7446_p1 = scmp.lt.s32.totalorder %s7444_s25, %s7437_s20 }
  0x30   : > { %p7440_p12 = pnand %p7438_p11, %p7398_p8 }
  0x31   : > { %p7447_p2 = por %p7446_p1, %p7445_p0 }
  0x32   : > { %p7441_p13 = pneg %p7440_p12 }
  0x34   : > { %p7448_p5 = pnand %p7447_p2, %p7441_p13 }
  0x36   : > { %7451 = shalt.err (!%p7448_p5)
}
  0x37   : > { %7301 = dma.hbm_to_vmem [thread:$0]  (!%p7541_p6), %s9322_s2, 16, %s7545_s23, [#allocation5]  }
  0x38   : > { %p9332_p7 = scmp.ne.s32.totalorder %s9329_s17, 0 }
  0x3a   : > { %204 = sbr.rel (%p9332_p7) target bundleno = 873 (0x369), region = 32 }
  0x41   : > { %p9333_p8 = scmp.ne.s32.totalorder %s9330_s18, 0 }
  0x43   : > { %7465 = dma.done.wait (%p9333_p8), [#allocation3], 512  }
  0x44   : > { %7467 = vsyncadd (%p9333_p8), [#allocation3], 4294966784 }
  0x45   : > { %7469 = dma.done.wait (%p9333_p8), [#allocation5], 16  }
  0x46   : > { %7471 = vsyncadd (%p9333_p8), [#allocation5], 4294967280  ;;  %p243_p3 = scmp.lt.s32.totalorder %s7474_s12, 1  ;;  %vm602_vm0 = vcmask 1041408   ;;  %vm547_vm1 = vcmask 31744   ;;  %vm1007_vm2 = vcmask 1046528  }
  0x47   : > { %vm398_vm3 = vsmask.f32 7424  ;;  %v1003_v0 = vld [vmem:[#allocation2 + $0xa] sm:$0x3]  ;;  %v304_v1 = vld [vmem:[#allocation2 + $0x2] sm:$0x3] }
  0x48   : > { %s9343_s12 = smov (!%p243_p3, %s7474_s12), 1  ;;  %7271 = vmatprep.subr.msk.bf16.mxu1 %vm602_vm0, %v1003_v0  ;;  %v1100_v3 = vsel %vm602_vm0, %v1003_v0, 0  ;;  %7269 = vmatprep.subr.msk.bf16.mxu0 %vm602_vm0, %v304_v1  ;;  %v604_v8 = vsel %vm602_vm0, %v304_v1, 0  ;;  %v301_v17 = vld [vmem:[#allocation2] sm:$0x3]  ;;  %vm2935_vm5 = vcmask 1045504  }
  0x49   : > { %s7285_s17 = smul.u32 172, %s9343_s12  ;;  %6306 = vmatpush3.bf16.msra.mxu1 %v1100_v3  ;;  %6230 = vmatpush3.bf16.msra.mxu0 %v604_v8  ;;  %v1000_v20 = vld [vmem:[#allocation2 + $0x8] sm:$0x3]  ;;  %v820_v22 = vsel %vm602_vm0, %v301_v17, 0  ;;  %vm1906_vm4 = vsmask.f32 6400 }
  0x4a   : > { %7270 = vmatprep.subr.msk.bf16.mxu0 %vm602_vm0, %v301_v17  ;;  %7272 = vmatprep.subr.msk.bf16.mxu1 %vm602_vm0, %v1000_v20  ;;  %v1280_v25 = vsel %vm602_vm0, %v1000_v20, 0  ;;  %v7732_v20 = vld [vmem:[#allocation2 + $0xc] sm:$0x3]  ;;  %vm4050_vm6 = vsmask.f32 5376  ;;  %s7286_s18 = smul.u32 1152, %s9343_s12 }
  0x4b   : > { %s7613_s28 = scalar_lea.vmem %s9320_s0, %s7285_s17  ;;  %vm4715_vm7 = vcmask 1044480  }
  0x4c   : > { %v265_v2 = vld [vmem:[%s7613_s28] sm:$0xf]  ;;  %v266_v4 = vld [vmem:[%s7613_s28 + $0x4] sm:$0xf]  ;;  %v7621_v5 = vld [vmem:[%s7613_s28 + $0x8] sm:$0xff]   ;;  %s8581_s30 = scalar_lea.vmem %s9323_s3, %s7286_s18 }
  0x4d   : > { %v7623_v6 = vcombine.low %v265_v2, %v266_v4  ;;  %v1001_v7 = vld [vmem:[%s7613_s28] sm:$0xe]  ;;  %v7628_v9 = vld [vmem:[%s7613_s28 + $0x10] sm:$0xff]   ;;  %v1009_v11 = vrot.slane %v7621_v5, 1  ;;  %v407_v12 = vshll.u32 %v7621_v5, 16  ;;  %v411_v16 = vshrl.u32 %v7621_v5, 16 }
  0x4e   : > { %v5519_v10 = vcombine.low %v1001_v7, %v266_v4  ;;  %v1011_v13 = vrot.slane %v7628_v9, 1  ;;  %v415_v21 = vshll.u32 %v7628_v9, 16  ;;  %v7644_v29 = vld [vmem:[%s7613_s28 + $0x18] sm:$0xff]   ;;  %v7648_v31 = vld [vmem:[%s7613_s28 + $0x20] sm:$0xff]   ;;  %v419_v32 = vshrl.u32 %v7628_v9, 16  ;;  %v7659_v37 = vld [vmem:[%s7613_s28 + $0x28] sm:$0xff]  }
  0x4f   : > { %v400_v14 = vshrl.u32 %v7623_v6, 16  ;;  %v402_v15 = vshll.u32 %v7623_v6, 16  ;;  %v409_v19 = vrot.slane %v407_v12, 1  ;;  %v1013_v34 = vrot.slane %v7644_v29, 1  ;;  %v7679_v50 = vld [vmem:[%s7613_s28 + $0x30] sm:$0xff]   ;;  %v7685_v54 = vld [vmem:[%s7613_s28 + $0x38] sm:$0xff]  }
  0x50   : > { %v1008_v18 = vrot.slane %v5519_v10, 1  ;;  %v1012_v23 = vsel %vm1007_vm2, %v1009_v11, %v1011_v13  ;;  %v417_v28 = vrot.slane %v415_v21, 1  ;;  %v423_v35 = vshll.u32 %v7644_v29, 16  ;;  %v7708_v3 = vld [vmem:[%s7613_s28 + $0x40] sm:$0xff]   ;;  %v7711_v8 = vld [vmem:[%s7613_s28 + $0x48] sm:$0xff]  }
  0x51   : > { %v404_v24 = vrot.slane %v402_v15, 1  ;;  %v413_v27 = vor.u32 %v411_v16, %v409_v19  ;;  %v427_v36 = vshrl.u32 %v7644_v29, 16  ;;  %v1015_v39 = vrot.slane %v7648_v31, 1 }
  0x52   : > { %v1010_v26 = vsel %vm1007_vm2, %v1008_v18, %v1009_v11  ;;  %v421_v40 = vor.u32 %v419_v32, %v417_v28  ;;  %v431_v41 = vshll.u32 %v7648_v31, 16  ;;  %v1014_v42 = vsel %vm1007_vm2, %v1011_v13, %v1013_v34  ;;  %v7727_v18 = vld [vmem:[#allocation2 + $0x4] sm:$0x3] }
  0x53   : > { %6307 = vmatprep.mubr.msk.bf16.mxu1 %vm547_vm1, %v1010_v26  ;;  %v405_v30 = vor.u32 %v404_v24, %v400_v14  ;;  %v7653_v33 = vsel %vm398_vm3, %v413_v27, %v417_v28  ;;  %v425_v43 = vrot.slane %v423_v35, 1  ;;  %v1017_v44 = vrot.slane %v7659_v37, 1  ;;  %v7745_v27 = vld [vmem:[%s7613_s28 + $0x58] sm:$0xff]  }
  0x54   : > { %6308 = vmatmul.mubr.msk.bf16.vlgmr.msra.gmra.mrb[0].mxu1 %vm547_vm1, %v1012_v23  ;;  %v435_v45 = vshrl.u32 %v7648_v31, 16  ;;  %v433_v46 = vrot.slane %v431_v41, 1  ;;  %v439_v47 = vshll.u32 %v7659_v37, 16  ;;  %v1016_v51 = vsel %vm1007_vm2, %v1013_v34, %v1015_v39  ;;  %v7741_v23 = vld [vmem:[%s7613_s28 + $0x50] sm:$0xff]  }
  0x55   : > { %v7662_v38 = vsel %vm398_vm3, %v405_v30, %v409_v19  ;;  %6344 = vmatpush3.bf16.msra.mxu1 %v1280_v25  ;;  %6311 = vmatprep.mubr.msk.bf16.mxu1 %vm547_vm1, %v1014_v42  ;;  %v7676_v48 = vsel %vm398_vm3, %v421_v40, %v425_v43  ;;  %v429_v49 = vor.u32 %v427_v36, %v425_v43  ;;  %v447_v56 = vshll.u32 %v7679_v50, 16 }
  0x56   : > { %6231 = vmatprep.mubr.msk.bf16.mxu0 %vm547_vm1, %v7662_v38  ;;  %v437_v52 = vor.u32 %v435_v45, %v433_v46  ;;  %v441_v53 = vrot.slane %v439_v47, 1  ;;  %v1018_v55 = vsel %vm1007_vm2, %v1015_v39, %v1017_v44  ;;  %v443_v58 = vshrl.u32 %v7659_v37, 16  ;;  %7275 = vmatprep.subr.msk.bf16.mxu1 %vm602_vm0, %v7732_v20  ;;  %v7768_v45 = vld [vmem:[%s7613_s28 + $0x60] sm:$0xff]  }
  0x57   : > { %6232 = vmatmul.mubr.msk.bf16.vlgmr.msra.gmra.mrb[0].mxu0 %vm547_vm1, %v7653_v33  ;;  %v7691_v57 = vsel %vm398_vm3, %v429_v49, %v433_v46  ;;  %v1019_v59 = vrot.slane %v7679_v50, 1  ;;  %v451_v61 = vshrl.u32 %v7679_v50, 16  ;;  %v455_v62 = vshll.u32 %v7685_v54, 16  ;;  %v7771_v49 = vld [vmem:[%s7613_s28 + $0x68] sm:$0xff]  }
  0x58   : > { %6268 = vmatpush3.bf16.msra.mxu0 %v820_v22  ;;  %6235 = vmatprep.mubr.msk.bf16.mxu0 %vm547_vm1, %v7676_v48  ;;  %v7697_v60 = vsel %vm398_vm3, %v437_v52, %v441_v53  ;;  %v1021_v63 = vrot.slane %v7685_v54, 1  ;;  %v449_v0 = vrot.slane %v447_v56, 1  ;;  %v445_v1 = vor.u32 %v443_v58, %v441_v53 }
  0x59   : > { %v1020_v2 = vsel %vm1007_vm2, %v1017_v44, %v1019_v59  ;;  %v457_v7 = vrot.slane %v455_v62, 1  ;;  %v463_v11 = vshll.u32 %v7708_v3, 16  ;;  %v459_v13 = vshrl.u32 %v7685_v54, 16  ;;  %7273 = vmatprep.subr.msk.bf16.mxu0 %vm602_vm0, %v7727_v18 }
  0x5a   : > { %v453_v4 = vor.u32 %v451_v61, %v449_v0  ;;  %v1022_v10 = vsel %vm1007_vm2, %v1019_v59, %v1021_v63  ;;  %v7717_v12 = vsel %vm398_vm3, %v445_v1, %v449_v0  ;;  %v1023_v14 = vrot.slane %v7708_v3, 1  ;;  %v7793_v1 = vld [vmem:[%s7613_s28 + $0x70] sm:$0xff]  }
  0x5b   : > { %v467_v16 = vshrl.u32 %v7708_v3, 16  ;;  %v471_v17 = vshll.u32 %v7711_v8, 16  ;;  %v1025_v19 = vrot.slane %v7711_v8, 1  ;;  %v465_v21 = vrot.slane %v463_v11, 1 }
  0x5c   : > { %6312 = vmatmul.mubr.msk.bf16.gmra.mrb[4].mxu1 %vm547_vm1, %v1016_v51  ;;  %v7723_v15 = vsel %vm398_vm3, %v453_v4, %v457_v7  ;;  %v461_v22 = vor.u32 %v459_v13, %v457_v7  ;;  %v1024_v24 = vsel %vm1007_vm2, %v1021_v63, %v1023_v14  ;;  %v479_v30 = vshll.u32 %v7741_v23, 16 }
  0x5d   : > { %6315 = vmatprep.mubr.msk.bf16.mxu1 %vm547_vm1, %v1018_v55  ;;  %v469_v25 = vor.u32 %v467_v16, %v465_v21  ;;  %v473_v26 = vrot.slane %v471_v17, 1  ;;  %v1026_v28 = vsel %vm1007_vm2, %v1023_v14, %v1025_v19  ;;  %v1027_v34 = vrot.slane %v7741_v23, 1 }
  0x5e   : > { %v7751_v32 = vsel %vm398_vm3, %v461_v22, %v465_v21  ;;  %v475_v35 = vshrl.u32 %v7711_v8, 16  ;;  %v483_v39 = vshrl.u32 %v7741_v23, 16  ;;  %v487_v40 = vshll.u32 %v7745_v27, 16 }
  0x5f   : > { %6236 = vmatmul.mubr.msk.bf16.gmra.mrb[4].mxu0 %vm547_vm1, %v7691_v57  ;;  %v7757_v36 = vsel %vm398_vm3, %v469_v25, %v473_v26  ;;  %v1029_v41 = vrot.slane %v7745_v27, 1  ;;  %v481_v42 = vrot.slane %v479_v30, 1  ;;  %v1028_v44 = vsel %vm1007_vm2, %v1025_v19, %v1027_v34  ;;  %v7820_v30 = vld [vmem:[%s7613_s28 + $0x80] sm:$0xff]  }
  0x60   : > { %6239 = vmatprep.mubr.msk.bf16.mxu0 %vm547_vm1, %v7697_v60  ;;  %v477_v43 = vor.u32 %v475_v35, %v473_v26  ;;  %v489_v47 = vrot.slane %v487_v40, 1  ;;  %v495_v52 = vshll.u32 %v7768_v45, 16  ;;  %v491_v55 = vshrl.u32 %v7745_v27, 16 }
  0x61   : > { %v485_v46 = vor.u32 %v483_v39, %v481_v42  ;;  %v1030_v51 = vsel %vm1007_vm2, %v1027_v34, %v1029_v41  ;;  %v1031_v56 = vrot.slane %v7768_v45, 1  ;;  %v499_v59 = vshrl.u32 %v7768_v45, 16  ;;  %v7823_v39 = vld [vmem:[%s7613_s28 + $0x88] sm:$0xff]  }
  0x62   : > { %v7777_v53 = vsel %vm398_vm3, %v477_v43, %v481_v42  ;;  %v503_v61 = vshll.u32 %v7771_v49, 16  ;;  %v1033_v62 = vrot.slane %v7771_v49, 1  ;;  %v497_v63 = vrot.slane %v495_v52, 1 }
  0x63   : > { %v7783_v58 = vsel %vm398_vm3, %v485_v46, %v489_v47  ;;  %v493_v0 = vor.u32 %v491_v55, %v489_v47  ;;  %v511_v13 = vshll.u32 %v7793_v1, 16  ;;  %v1035_v16 = vrot.slane %v7793_v1, 1 }
  0x64   : > { %6316 = vmatmul.mubr.msk.bf16.gmra.mrb[8].mxu1 %vm547_vm1, %v1020_v2  ;;  %v1032_v2 = vsel %vm1007_vm2, %v1029_v41, %v1031_v56  ;;  %v501_v4 = vor.u32 %v499_v59, %v497_v63  ;;  %v505_v7 = vrot.slane %v503_v61, 1  ;;  %v1034_v11 = vsel %vm1007_vm2, %v1031_v56, %v1033_v62  ;;  %v7353_v56 = vld [vmem:[%s7613_s28 + $0x90] ss:$0 sps:$4 sm:$0x11]  }
  0x65   : > { %6319 = vmatprep.mubr.msk.bf16.mxu1 %vm547_vm1, %v1022_v10  ;;  %v7797_v10 = vld [vmem:[%s7613_s28 + $0x78] sm:$0xff]   ;;  %v7803_v14 = vsel %vm398_vm3, %v493_v0, %v497_v63  ;;  %v507_v17 = vshrl.u32 %v7771_v49, 16  ;;  %v515_v21 = vshrl.u32 %v7793_v1, 16  ;;  %v513_v25 = vrot.slane %v511_v13, 1 }
  0x66   : > { %v7809_v19 = vsel %vm398_vm3, %v501_v4, %v505_v7  ;;  %v519_v22 = vshll.u32 %v7797_v10, 16  ;;  %v527_v41 = vshll.u32 %v7820_v30, 16  ;;  %v523_v43 = vshrl.u32 %v7797_v10, 16 }
  0x67   : > { %6240 = vmatmul.mubr.msk.bf16.gmra.mrb[8].mxu0 %vm547_vm1, %v7717_v12  ;;  %v509_v26 = vor.u32 %v507_v17, %v505_v7  ;;  %v517_v34 = vor.u32 %v515_v21, %v513_v25  ;;  %v531_v47 = vshrl.u32 %v7820_v30, 16  ;;  %v1041_v52 = vrot.slane %v7823_v39, 1 }
  0x68   : > { %6243 = vmatprep.mubr.msk.bf16.mxu0 %vm547_vm1, %v7723_v15  ;;  %v521_v35 = vrot.slane %v519_v22, 1  ;;  %v529_v55 = vrot.slane %v527_v41, 1  ;;  %v539_v7 = vshrl.u32 %v7823_v39, 16 }
  0x69   : > { %v7829_v42 = vsel %vm398_vm3, %v509_v26, %v513_v25  ;;  %v7870_v25 = vld [vmem:[#allocation2 + $0x12] sm:$0x3]  ;;  %v1683_v26 = vsel %vm602_vm0, %v7727_v18, 0 }
  0x6a   : > { %v7835_v46 = vsel %vm398_vm3, %v517_v34, %v521_v35  ;;  %v525_v59 = vor.u32 %v523_v43, %v521_v35 }
  0x6c   : > { %6320 = vmatmul.mubr.msk.bf16.gmra.mrb[12].mxu1 %vm547_vm1, %v1024_v24  ;;  %v1037_v24 = vrot.slane %v7797_v10, 1  ;;  %v7849_v4 = vsel %vm398_vm3, %v525_v59, %v529_v55  ;;  %v8002_v59 = vld [vmem:[%s7613_s28 + $0x40] sm:$0xff]  }
  0x6d   : > { %6323 = vmatprep.mubr.msk.bf16.mxu1 %vm547_vm1, %v1026_v28  ;;  %v1036_v28 = vsel %vm1007_vm2, %v1033_v62, %v1035_v16  ;;  %v533_v62 = vor.u32 %v531_v47, %v529_v55 }
  0x6e   : > { %v1038_v40 = vsel %vm1007_vm2, %v1035_v16, %v1037_v24 }
  0x6f   : > { %6244 = vmatmul.mubr.msk.bf16.gmra.mrb[12].mxu0 %vm547_vm1, %v7751_v32 }
  0x70   : > { %6247 = vmatprep.mubr.msk.bf16.mxu0 %vm547_vm1, %v7757_v36 }
  0x74   : > { %6324 = vmatmul.mubr.msk.bf16.gmra.mrb[16].mxu1 %vm547_vm1, %v1028_v44  ;;  %v1039_v44 = vrot.slane %v7820_v30, 1 }
  0x75   : > { %6327 = vmatprep.mubr.msk.bf16.mxu1 %vm547_vm1, %v1030_v51  ;;  %v535_v51 = vshll.u32 %v7823_v39, 16 }
  0x76   : > { %v1040_v61 = vsel %vm1007_vm2, %v1037_v24, %v1039_v44  ;;  %v1042_v0 = vsel %vm1007_vm2, %v1039_v44, %v1041_v52  ;;  %v2350_v24 = vsel %vm602_vm0, %v7732_v20, 0 }
  0x77   : > { %6248 = vmatmul.mubr.msk.bf16.gmra.mrb[16].mxu0 %vm547_vm1, %v7777_v53  ;;  %v537_v63 = vrot.slane %v535_v51, 1  ;;  %v7994_v51 = vld [vmem:[%s7613_s28 + $0x38] sm:$0xff]  }
  0x78   : > { %6251 = vmatprep.mubr.msk.bf16.mxu0 %vm547_vm1, %v7783_v58 }
  0x79   : > { %v538_v13 = vsel %vm398_vm3, %v533_v62, %v537_v63  ;;  %v541_v17 = vor.u32 %v539_v7, %v537_v63  ;;  %v1964_v7 = vshll.u32 %v7994_v51, 16 }
  0x7c   : > { %6328 = vmatmul.mubr.msk.bf16.gmra.mrb[20].mxu1 %vm547_vm1, %v1032_v2  ;;  %v543_v2 = vshll.u32 %v7353_v56, 16 }
  0x7d   : > { %6331 = vmatprep.mubr.msk.bf16.mxu1 %vm547_vm1, %v1034_v11  ;;  %v1043_v11 = vrot.slane %v7353_v56, 1 }
  0x7e   : > { %v545_v16 = vrot.slane %v543_v2, 1 }
  0x7f   : > { %6252 = vmatmul.mubr.msk.bf16.gmra.mrb[20].mxu0 %vm547_vm1, %v7803_v14  ;;  %v1044_v21 = vsel %vm1007_vm2, %v1041_v52, %v1043_v11  ;;  %v2568_v52 = vsel %vm602_vm0, %v7870_v25, 0 }
  0x80   : > { %6255 = vmatprep.mubr.msk.bf16.mxu0 %vm547_vm1, %v7809_v19  ;;  %v7860_v22 = vsel %vm398_vm3, %v541_v17, %v545_v16  ;;  %v1973_v16 = vshll.u32 %v8002_v59, 16  ;;  %v8024_v17 = vld [vmem:[#allocation2 + $0x1a] sm:$0x3] }
  0x84   : > { %6332 = vmatmul.mubr.msk.bf16.gmra.mrb[24].mxu1 %vm547_vm1, %v1036_v28 }
  0x85   : > { %6335 = vmatprep.mubr.msk.bf16.mxu1 %vm547_vm1, %v1038_v40 }
  0x87   : > { %6256 = vmatmul.mubr.msk.bf16.gmra.mrb[24].mxu0 %vm547_vm1, %v7829_v42 }
  0x88   : > { %6259 = vmatprep.mubr.msk.bf16.mxu0 %vm547_vm1, %v7835_v46 }
  0x8c   : > { %6336 = vmatmul.mubr.msk.bf16.gmra.mrb[28].mxu1 %vm547_vm1, %v1040_v61  ;;  %v8004_v61 = vld [vmem:[#allocation2 + $0x10] sm:$0x3] }
  0x8d   : > { %6339 = vmatprep.mubr.msk.bf16.mxu1 %vm547_vm1, %v1042_v0 }
  0x8f   : > { %6260 = vmatmul.mubr.msk.bf16.gmra.mrb[28].mxu0 %vm547_vm1, %v7849_v4 }
  0x90   : > { %6263 = vmatprep.mubr.msk.bf16.mxu0 %vm547_vm1, %v538_v13 }
  0x94   : > { %6340 = vmatmul.mubr.msk.bf16.gmra.mrb[32].mxu1 %vm547_vm1, %v1044_v21 }
  0x95   : > { %6345 = vmatprep.mubr.msk.bf16.mxu1 %vm547_vm1, %v7662_v38  ;;  %v7878_v38 = vld [vmem:[#allocation2 + $0x6] sm:$0x3] }
  0x96   : > { %v2132_v63 = vsel %vm602_vm0, %v7878_v38, 0 }
  0x97   : > { %6264 = vmatmul.mubr.msk.bf16.gmra.mrb[32].mxu0 %vm547_vm1, %v7860_v22 }
  0x98   : > { %6269 = vmatprep.mubr.msk.bf16.mxu0 %vm547_vm1, %v7623_v6  ;;  %v7928_v6 = vld [vmem:[%s7613_s28 + $0xc] sm:$0xf] }
  0x9c   : > { %6346 = vmatmul.mubr.msk.bf16.vlgmr.msra.gmra.mrb[0].mxu1 %vm547_vm1, %v7653_v33 }
  0x9d   : > { %6458 = vmatpush3.bf16.msra.mxu1 %v2350_v24  ;;  %6349 = vmatprep.mubr.msk.bf16.mxu1 %vm547_vm1, %v7676_v48 }
  0x9e   : > { %7276 = vmatprep.subr.msk.bf16.mxu1 %vm602_vm0, %v7870_v25  ;;  %v1966_v25 = vrot.slane %v1964_v7, 2 }
  0x9f   : > { %6270 = vmatmul.mubr.msk.bf16.vlgmr.msra.gmra.mrb[0].mxu0 %vm547_vm1, %v7621_v5  ;;  %v1459_v5 = vld [vmem:[%s7613_s28 + $0x8] sm:$0xe] }
  0xa0   : > { %6382 = vmatpush3.bf16.msra.mxu0 %v1683_v26  ;;  %6273 = vmatprep.mubr.msk.bf16.mxu0 %vm547_vm1, %v7628_v9  ;;  %v5556_v9 = vcombine.low %v1459_v5, %v7928_v6 }
  0xa1   : > { %7274 = vmatprep.subr.msk.bf16.mxu0 %vm602_vm0, %v7878_v38  ;;  %v8036_v38 = vld [vmem:[%s7613_s28 + $0x48] sm:$0xff]  }
  0xa2   : > { %v1911_v33 = vshll.u32 %v5556_v9, 16 }
  0xa4   : > { %6350 = vmatmul.mubr.msk.bf16.gmra.mrb[4].mxu1 %vm547_vm1, %v7691_v57  ;;  %v1913_v57 = vrot.slane %v1911_v33, 2  ;;  %v8044_v33 = vld [vmem:[%s7613_s28 + $0x50] sm:$0xff]  }
  0xa5   : > { %6353 = vmatprep.mubr.msk.bf16.mxu1 %vm547_vm1, %v7697_v60 }
  0xa7   : > { %6274 = vmatmul.mubr.msk.bf16.gmra.mrb[4].mxu0 %vm547_vm1, %v7644_v29  ;;  %v7934_v29 = vld [vmem:[%s7613_s28 + $0x10] sm:$0xff]  }
  0xa8   : > { %6277 = vmatprep.mubr.msk.bf16.mxu0 %vm547_vm1, %v7648_v31  ;;  %v1908_v31 = vshrl.u32 %v5556_v9, 16  ;;  %v1919_v48 = vshll.u32 %v7934_v29, 16 }
  0xac   : > { %6354 = vmatmul.mubr.msk.bf16.gmra.mrb[8].mxu1 %vm547_vm1, %v7717_v12 }
  0xad   : > { %6357 = vmatprep.mubr.msk.bf16.mxu1 %vm547_vm1, %v7723_v15 }
  0xaf   : > { %6278 = vmatmul.mubr.msk.bf16.gmra.mrb[8].mxu0 %vm547_vm1, %v7659_v37  ;;  %v1916_v37 = vshrl.u32 %v7934_v29, 16 }
  0xb0   : > { %6281 = vmatprep.mubr.msk.bf16.mxu0 %vm547_vm1, %v7679_v50  ;;  %v7947_v50 = vld [vmem:[%s7613_s28 + $0x18] sm:$0xff]  }
  0xb1   : > { %v1918_v60 = vrot.slane %v1916_v37, 1  ;;  %v1925_v12 = vshrl.u32 %v7947_v50, 16  ;;  %v1928_v15 = vshll.u32 %v7947_v50, 16 }
  0xb4   : > { %6358 = vmatmul.mubr.msk.bf16.gmra.mrb[12].mxu1 %vm547_vm1, %v7751_v32  ;;  %v1927_v32 = vrot.slane %v1925_v12, 1  ;;  %v1988_v12 = vshrl.u32 %v8044_v33, 16 }
  0xb5   : > { %6361 = vmatprep.mubr.msk.bf16.mxu1 %vm547_vm1, %v7757_v36  ;;  %v1930_v36 = vrot.slane %v1928_v15, 2  ;;  %v1991_v15 = vshll.u32 %v8044_v33, 16 }
  0xb7   : > { %6282 = vmatmul.mubr.msk.bf16.gmra.mrb[12].mxu0 %vm547_vm1, %v7685_v54  ;;  %v1910_v54 = vrot.slane %v1908_v31, 1  ;;  %v1975_v31 = vrot.slane %v1973_v16, 2 }
  0xb8   : > { %6285 = vmatprep.mubr.msk.bf16.mxu0 %vm547_vm1, %v7708_v3  ;;  %v1921_v3 = vrot.slane %v1919_v48, 2 }
  0xb9   : > { %v1914_v18 = vor.u32 %v1913_v57, %v1910_v54  ;;  %v1979_v57 = vshrl.u32 %v8036_v38, 16 }
  0xba   : > { %v1922_v20 = vor.u32 %v1921_v3, %v1918_v60  ;;  %v1982_v60 = vshll.u32 %v8036_v38, 16 }
  0xbc   : > { %6362 = vmatmul.mubr.msk.bf16.gmra.mrb[16].mxu1 %vm547_vm1, %v7777_v53  ;;  %v7965_v53 = vld [vmem:[%s7613_s28 + $0x28] sm:$0xff]  }
  0xbd   : > { %6365 = vmatprep.mubr.msk.bf16.mxu1 %vm547_vm1, %v7783_v58  ;;  %v7968_v58 = vsel %vm1906_vm4, %v1914_v18, %v1922_v20  ;;  %v1946_v34 = vshll.u32 %v7965_v53, 16  ;;  %v1598_v21 = vrot.slane %v7965_v53, 1  ;;  %v1602_v18 = vrot.slane %v7994_v51, 1 }
  0xbf   : > { %6286 = vmatmul.mubr.msk.bf16.gmra.mrb[16].mxu0 %vm547_vm1, %v7711_v8  ;;  %v7950_v8 = vld [vmem:[%s7613_s28 + $0x20] sm:$0xff]  }
  0xc0   : > { %6289 = vmatprep.mubr.msk.bf16.mxu0 %vm547_vm1, %v7741_v23  ;;  %v1934_v23 = vshrl.u32 %v7950_v8, 16  ;;  %v1596_v47 = vrot.slane %v7950_v8, 1 }
  0xc2   : > { %v8049_v37 = vsel %vm1007_vm2, %v1596_v47, %v1598_v21 }
  0xc4   : > { %6366 = vmatmul.mubr.msk.bf16.gmra.mrb[20].mxu1 %vm547_vm1, %v7803_v14 }
  0xc5   : > { %6369 = vmatprep.mubr.msk.bf16.mxu1 %vm547_vm1, %v7809_v19  ;;  %v7971_v19 = vld [vmem:[%s7613_s28 + $0x30] sm:$0xff]  }
  0xc6   : > { %v1952_v40 = vshrl.u32 %v7971_v19, 16  ;;  %v1955_v41 = vshll.u32 %v7971_v19, 16  ;;  %v1600_v26 = vrot.slane %v7971_v19, 1 }
  0xc7   : > { %6290 = vmatmul.mubr.msk.bf16.gmra.mrb[20].mxu0 %vm547_vm1, %v7745_v27  ;;  %v1937_v27 = vshll.u32 %v7950_v8, 16 }
  0xc8   : > { %6293 = vmatprep.mubr.msk.bf16.mxu0 %vm547_vm1, %v7768_v45  ;;  %v1591_v45 = vrot.slane %v5556_v9, 1  ;;  %v1957_v56 = vrot.slane %v1955_v41, 2  ;;  %v8054_v54 = vsel %vm1007_vm2, %v1598_v21, %v1600_v26 }
  0xc9   : > { %v1939_v14 = vrot.slane %v1937_v27, 2  ;;  %v1984_v27 = vrot.slane %v1982_v60, 2 }
  0xcc   : > { %6370 = vmatmul.mubr.msk.bf16.gmra.mrb[24].mxu1 %vm547_vm1, %v7829_v42  ;;  %v1594_v42 = vrot.slane %v7947_v50, 1 }
  0xcd   : > { %6373 = vmatprep.mubr.msk.bf16.mxu1 %vm547_vm1, %v7835_v46  ;;  %v1948_v46 = vrot.slane %v1946_v34, 2 }
  0xce   : > { %v8016_v2 = vsel %vm1007_vm2, %v1594_v42, %v1596_v47 }
  0xcf   : > { %6294 = vmatmul.mubr.msk.bf16.gmra.mrb[24].mxu0 %vm547_vm1, %v7771_v49  ;;  %v1592_v49 = vrot.slane %v7934_v29, 1 }
  0xd0   : > { %6297 = vmatprep.mubr.msk.bf16.mxu0 %vm547_vm1, %v7793_v1  ;;  %v1936_v1 = vrot.slane %v1934_v23, 1  ;;  %v1981_v23 = vrot.slane %v1979_v57, 1 }
  0xd1   : > { %v7978_v28 = vsel %vm1007_vm2, %v1591_v45, %v1592_v49  ;;  %v8009_v62 = vsel %vm1007_vm2, %v1592_v49, %v1594_v42  ;;  %v1990_v49 = vrot.slane %v1988_v12, 1 }
  0xd2   : > { %v1940_v35 = vor.u32 %v1939_v14, %v1936_v1  ;;  %v1993_v1 = vrot.slane %v1991_v15, 2  ;;  %v8076_v14 = vld [vmem:[%s7613_s28 + $0x60] sm:$0xff]   ;;  %v8134_v15 = vld [vmem:[%s7613_s28 + $0x78] sm:$0xff]  }
  0xd3   : > { %v2006_v42 = vshrl.u32 %v8076_v14, 16  ;;  %v1612_v12 = vrot.slane %v8076_v14, 1 }
  0xd4   : > { %6374 = vmatmul.mubr.msk.bf16.gmra.mrb[28].mxu1 %vm547_vm1, %v7849_v4  ;;  %v1961_v4 = vshrl.u32 %v7994_v51, 16  ;;  %v1994_v41 = vor.u32 %v1993_v1, %v1990_v49 }
  0xd5   : > { %6377 = vmatprep.mubr.msk.bf16.mxu1 %vm547_vm1, %v538_v13  ;;  %v1970_v13 = vshrl.u32 %v8002_v59, 16 }
  0xd6   : > { %v1963_v24 = vrot.slane %v1961_v4, 1  ;;  %v2008_v4 = vrot.slane %v2006_v42, 1 }
  0xd7   : > { %6298 = vmatmul.mubr.msk.bf16.gmra.mrb[28].mxu0 %vm547_vm1, %v7797_v10  ;;  %v1931_v10 = vor.u32 %v1930_v36, %v1927_v32  ;;  %v1972_v9 = vrot.slane %v1970_v13, 1  ;;  %v1604_v32 = vrot.slane %v8002_v59, 1  ;;  %v8070_v36 = vld [vmem:[%s7613_s28 + $0x58] sm:$0xff]  }
  0xd8   : > { %6301 = vmatprep.mubr.msk.bf16.mxu0 %vm547_vm1, %v7820_v30  ;;  %v1943_v30 = vshrl.u32 %v7965_v53, 16  ;;  %v1967_v48 = vor.u32 %v1966_v25, %v1963_v24 }
  0xd9   : > { %v7990_v43 = vsel %vm1906_vm4, %v1922_v20, %v1931_v10  ;;  %v7999_v55 = vsel %vm1906_vm4, %v1931_v10, %v1940_v35  ;;  %v1976_v3 = vor.u32 %v1975_v31, %v1972_v9  ;;  %v8081_v10 = vsel %vm1007_vm2, %v1600_v26, %v1602_v18 }
  0xda   : > { %v1945_v44 = vrot.slane %v1943_v30, 1  ;;  %v1985_v30 = vor.u32 %v1984_v27, %v1981_v23  ;;  %v8086_v34 = vsel %vm1007_vm2, %v1602_v18, %v1604_v32 }
  0xdb   : > { %v8073_v45 = vsel %vm1906_vm4, %v1967_v48, %v1976_v3 }
  0xdc   : > { %6378 = vmatmul.mubr.msk.bf16.gmra.mrb[32].mxu1 %vm547_vm1, %v7860_v22  ;;  %v1949_v0 = vor.u32 %v1948_v46, %v1945_v44  ;;  %v2009_v44 = vshll.u32 %v8076_v14, 16  ;;  %v1606_v46 = vrot.slane %v8036_v38, 1  ;;  %v8098_v47 = vsel %vm1906_vm4, %v1976_v3, %v1985_v30 }
  0xdd   : > { %6459 = vmatprep.mubr.msk.bf16.mxu1 %vm547_vm1, %v7968_v58 }
  0xde   : > { %v8032_v22 = vsel %vm1906_vm4, %v1940_v35, %v1949_v0  ;;  %v1997_v35 = vshrl.u32 %v8070_v36, 16  ;;  %v2011_v7 = vrot.slane %v2009_v44, 2  ;;  %v8113_v13 = vsel %vm1007_vm2, %v1604_v32, %v1606_v46  ;;  %v8140_v32 = vld [vmem:[%s7613_s28 + $0x80] sm:$0xff]  }
  0xdf   : > { %6302 = vmatmul.mubr.msk.bf16.gmra.mrb[32].mxu0 %vm547_vm1, %v7823_v39  ;;  %v1954_v39 = vrot.slane %v1952_v40, 1  ;;  %v2000_v40 = vshll.u32 %v8070_v36, 16  ;;  %9334 = vst [vmem:[#allocation8_spill] sm:$0xff] %v8140_v32  ;;  %v2042_v42 = vshrl.u32 %v8140_v32, 16  ;;  %v2045_v44 = vshll.u32 %v8140_v32, 16 }
  0xe0   : > { %6383 = vmatprep.mubr.msk.bf16.mxu0 %vm547_vm1, %v7978_v28  ;;  %v2012_v26 = vor.u32 %v2011_v7, %v2008_v4  ;;  %v8166_v7 = vld [vmem:[%s7613_s28 + $0x88] sm:$0xff]  }
  0xe1   : > { %v1958_v11 = vor.u32 %v1957_v56, %v1954_v39  ;;  %v2002_v39 = vrot.slane %v2000_v40, 2  ;;  %v1608_v56 = vrot.slane %v8044_v33, 1  ;;  %v2036_v40 = vshll.u32 %v8134_v15, 16 }
  0xe3   : > { %v8041_v5 = vsel %vm1906_vm4, %v1949_v0, %v1958_v11  ;;  %v8066_v20 = vsel %vm1906_vm4, %v1958_v11, %v1967_v48  ;;  %v8105_v0 = vsel %vm1906_vm4, %v1985_v30, %v1994_v41  ;;  %v8108_v11 = vld [vmem:[%s7613_s28 + $0x70] sm:$0xff]   ;;  %v8118_v21 = vsel %vm1007_vm2, %v1606_v46, %v1608_v56 }
  0xe4   : > { %6460 = vmatmul.mubr.msk.bf16.vlgmr.msra.gmra.mrb[0].mxu1 %vm547_vm1, %v7990_v43  ;;  %v2024_v9 = vshrl.u32 %v8108_v11, 16  ;;  %v2027_v31 = vshll.u32 %v8108_v11, 16  ;;  %v1610_v48 = vrot.slane %v8070_v36, 1  ;;  %v1616_v4 = vrot.slane %v8108_v11, 1 }
  0xe5   : > { %6496 = vmatpush3.bf16.msra.mxu1 %v2568_v52  ;;  %6463 = vmatprep.mubr.msk.bf16.mxu1 %vm547_vm1, %v7999_v55  ;;  %v1999_v52 = vrot.slane %v1997_v35, 1  ;;  %v2033_v35 = vshrl.u32 %v8134_v15, 16 }
  0xe6   : > { %7277 = vmatprep.subr.msk.bf16.mxu1 %vm602_vm0, %v8004_v61  ;;  %v2026_v23 = vrot.slane %v2024_v9, 1  ;;  %v2029_v27 = vrot.slane %v2027_v31, 2  ;;  %v8145_v49 = vsel %vm1007_vm2, %v1608_v56, %v1610_v48  ;;  %v8150_v30 = vsel %vm1007_vm2, %v1610_v48, %v1612_v12  ;;  %v8172_v9 = vld [vmem:[%s7613_s28 + $0x90] sm:$0xff]  }
  0xe7   : > { %6384 = vmatmul.mubr.msk.bf16.vlgmr.msra.gmra.mrb[0].mxu0 %vm547_vm1, %v8009_v62  ;;  %v2003_v16 = vor.u32 %v2002_v39, %v1999_v52  ;;  %v2035_v39 = vrot.slane %v2033_v35, 1  ;;  %v2038_v56 = vrot.slane %v2036_v40, 2 }
  0xe8   : > { %6420 = vmatpush3.bf16.msra.mxu0 %v2132_v63  ;;  %6387 = vmatprep.mubr.msk.bf16.mxu0 %vm547_vm1, %v8016_v2  ;;  %v8102_v63 = vld [vmem:[%s7613_s28 + $0x68] sm:$0xff]  }
  0xe9   : > { %7279 = vmatprep.subr.msk.bf16.mxu0 %vm602_vm0, %v8024_v17  ;;  %v2015_v24 = vshrl.u32 %v8102_v63, 16  ;;  %v2018_v25 = vshll.u32 %v8102_v63, 16  ;;  %v8130_v57 = vsel %vm1906_vm4, %v1994_v41, %v2003_v16  ;;  %v8137_v18 = vsel %vm1906_vm4, %v2003_v16, %v2012_v26 }
  0xea   : > { %v2030_v41 = vor.u32 %v2029_v27, %v2026_v23  ;;  %v1614_v46 = vrot.slane %v8102_v63, 1  ;;  %v2060_v27 = vshrl.u32 %v8172_v9, 16 }
  0xeb   : > { %v2017_v60 = vrot.slane %v2015_v24, 1  ;;  %v2020_v3 = vrot.slane %v2018_v25, 2  ;;  %v2044_v24 = vrot.slane %v2042_v42, 1  ;;  %v2047_v25 = vrot.slane %v2045_v44, 2 }
  0xec   : > { %6464 = vmatmul.mubr.msk.bf16.gmra.mrb[4].mxu1 %vm547_vm1, %v8032_v22  ;;  %v8177_v31 = vsel %vm1007_vm2, %v1612_v12, %v1614_v46  ;;  %v8182_v48 = vsel %vm1007_vm2, %v1614_v46, %v1616_v4  ;;  %v1618_v12 = vrot.slane %v8134_v15, 1  ;;  %v1620_v44 = vrot.slane %v8140_v32, 1  ;;  %v8198_v46 = vld [vmem:[%s7613_s28 + $0x98] ss:$0 sps:$4 sm:$0x33]  }
  0xed   : > { %6467 = vmatprep.mubr.msk.bf16.mxu1 %vm547_vm1, %v8041_v5  ;;  %v2021_v1 = vor.u32 %v2020_v3, %v2017_v60  ;;  %v2051_v60 = vshrl.u32 %v8166_v7, 16  ;;  %v2054_v3 = vshll.u32 %v8166_v7, 16  ;;  %v2048_v23 = vor.u32 %v2047_v25, %v2044_v24  ;;  %9335 = vst [vmem:[#allocation9_spill] sm:$0xff] %v8198_v46 }
  0xee   : > { %v8206_v25 = vsel %vm1007_vm2, %v1616_v4, %v1618_v12  ;;  %v1622_v4 = vrot.slane %v8166_v7, 1 }
  0xef   : > { %6388 = vmatmul.mubr.msk.bf16.gmra.mrb[4].mxu0 %vm547_vm1, %v8049_v37  ;;  %v8162_v52 = vsel %vm1906_vm4, %v2012_v26, %v2021_v1  ;;  %v8169_v16 = vsel %vm1906_vm4, %v2021_v1, %v2030_v41  ;;  %v2039_v26 = vor.u32 %v2038_v56, %v2035_v39  ;;  %v2063_v1 = vshll.u32 %v8172_v9, 16 }
  0xf0   : > { %6391 = vmatprep.mubr.msk.bf16.mxu0 %vm547_vm1, %v8054_v54  ;;  %v2053_v40 = vrot.slane %v2051_v60, 1  ;;  %v2056_v42 = vrot.slane %v2054_v3, 2  ;;  %v2062_v56 = vrot.slane %v2060_v27, 1  ;;  %v8211_v60 = vsel %vm1007_vm2, %v1618_v12, %v1620_v44 }
  0xf1   : > { %v8194_v35 = vsel %vm1906_vm4, %v2030_v41, %v2039_v26  ;;  %v8201_v39 = vsel %vm1906_vm4, %v2039_v26, %v2048_v23  ;;  %v2065_v24 = vrot.slane %v2063_v1, 2  ;;  %v2069_v3 = vshrl.u32 %v8198_v46, 16 }
  0xf2   : > { %v2057_v41 = vor.u32 %v2056_v42, %v2053_v40  ;;  %v2072_v26 = vshll.u32 %v8198_v46, 16  ;;  %v1624_v12 = vrot.slane %v8172_v9, 1 }
  0xf3   : > { %v2066_v27 = vor.u32 %v2065_v24, %v2062_v56  ;;  %v2071_v40 = vrot.slane %v2069_v3, 1  ;;  %v8230_v56 = vsel %vm1007_vm2, %v1620_v44, %v1622_v4  ;;  %v7373_v24 = vld [vmem:[%s7613_s28 + $0x98] ss:$0 sps:$4 sm:$0x11]  }
  0xf4   : > { %6468 = vmatmul.mubr.msk.bf16.gmra.mrb[8].mxu1 %vm547_vm1, %v8066_v20  ;;  %v8221_v1 = vsel %vm1906_vm4, %v2048_v23, %v2057_v41  ;;  %v2074_v42 = vrot.slane %v2072_v26, 2  ;;  %v8236_v23 = vsel %vm1007_vm2, %v1622_v4, %v1624_v12  ;;  %v2748_v26 = vsel %vm602_vm0, %v8004_v61, 0  ;;  %v2928_v4 = vld [vmem:[#allocation2 + $0x18] sm:$0x3]  ;;  %v2929_v61 = vld [vmem:[%s7613_s28 + $0x8] sm:$0xc] }
  0xf5   : > { %6471 = vmatprep.mubr.msk.bf16.mxu1 %vm547_vm1, %v8073_v45  ;;  %v8225_v32 = vsel %vm1906_vm4, %v2057_v41, %v2066_v27  ;;  %v1626_v41 = vrot.slane %v7373_v24, 1 }
  0xf6   : > { %v2075_v46 = vor.u32 %v2074_v42, %v2071_v40  ;;  %v2937_v42 = vrot.slane %v7934_v29, 2  ;;  %v2941_v29 = vrot.slane %v7950_v8, 2  ;;  %v8358_v8 = vld [vmem:[#allocation2 + $0x1c] sm:$0x3] }
  0xf7   : > { %6392 = vmatmul.mubr.msk.bf16.gmra.mrb[8].mxu0 %vm547_vm1, %v8081_v10  ;;  %v8248_v44 = vsel %vm1007_vm2, %v1624_v12, %v1626_v41  ;;  %v8343_v41 = vld [vmem:[#allocation2 + $0x14] sm:$0x3] }
  0xf8   : > { %6395 = vmatprep.mubr.msk.bf16.mxu0 %vm547_vm1, %v8086_v34  ;;  %v8243_v3 = vsel %vm1906_vm4, %v2066_v27, %v2075_v46  ;;  %v2931_v46 = vld [vmem:[#allocation2 + $0xe] sm:$0x3]  ;;  %v3246_v27 = vsel %vm602_vm0, %v8024_v17, 0  ;;  %v5666_v17 = vcombine.low %v2929_v61, %v7928_v6  ;;  %v2939_v6 = vrot.slane %v7947_v50, 2  ;;  %v9336_v61 = vld [vmem:[#allocation8_spill] sm:$0xff] }
  0xf9   : > { %v3028_v24 = vsel %vm602_vm0, %v2931_v46, 0 }
  0xfa   : > { %v2936_v40 = vrot.slane %v5666_v17, 2  ;;  %v8354_v50 = vsel %vm2935_vm5, %v2939_v6, %v2941_v29  ;;  %v9337_v17 = vld [vmem:[#allocation9_spill] sm:$0xff] }
  0xfc   : > { %6472 = vmatmul.mubr.msk.bf16.gmra.mrb[12].mxu1 %vm547_vm1, %v8098_v47  ;;  %v8334_v12 = vsel %vm2935_vm5, %v2936_v40, %v2937_v42  ;;  %v2971_v40 = vrot.slane %v9337_v17, 2 }
  0xfd   : > { %6475 = vmatprep.mubr.msk.bf16.mxu1 %vm547_vm1, %v8105_v0 }
  0xff   : > { %6396 = vmatmul.mubr.msk.bf16.gmra.mrb[12].mxu0 %vm547_vm1, %v8113_v13 }
 0x100   : > { %6399 = vmatprep.mubr.msk.bf16.mxu0 %vm547_vm1, %v8118_v21 }
 0x104   : > { %6476 = vmatmul.mubr.msk.bf16.gmra.mrb[16].mxu1 %vm547_vm1, %v8130_v57 }
 0x105   : > { %6479 = vmatprep.mubr.msk.bf16.mxu1 %vm547_vm1, %v8137_v18 }
 0x107   : > { %6400 = vmatmul.mubr.msk.bf16.gmra.mrb[16].mxu0 %vm547_vm1, %v8145_v49 }
 0x108   : > { %6403 = vmatprep.mubr.msk.bf16.mxu0 %vm547_vm1, %v8150_v30 }
 0x10c   : > { %6480 = vmatmul.mubr.msk.bf16.gmra.mrb[20].mxu1 %vm547_vm1, %v8162_v52 }
 0x10d   : > { %6483 = vmatprep.mubr.msk.bf16.mxu1 %vm547_vm1, %v8169_v16 }
 0x10f   : > { %6404 = vmatmul.mubr.msk.bf16.gmra.mrb[20].mxu0 %vm547_vm1, %v8177_v31 }
 0x110   : > { %6407 = vmatprep.mubr.msk.bf16.mxu0 %vm547_vm1, %v8182_v48 }
 0x114   : > { %6484 = vmatmul.mubr.msk.bf16.gmra.mrb[24].mxu1 %vm547_vm1, %v8194_v35 }
 0x115   : > { %6487 = vmatprep.mubr.msk.bf16.mxu1 %vm547_vm1, %v8201_v39 }
 0x117   : > { %6408 = vmatmul.mubr.msk.bf16.gmra.mrb[24].mxu0 %vm547_vm1, %v8206_v25 }
 0x118   : > { %6411 = vmatprep.mubr.msk.bf16.mxu0 %vm547_vm1, %v8211_v60 }
 0x11c   : > { %6488 = vmatmul.mubr.msk.bf16.gmra.mrb[28].mxu1 %vm547_vm1, %v8221_v1 }
 0x11d   : > { %6491 = vmatprep.mubr.msk.bf16.mxu1 %vm547_vm1, %v8225_v32 }
 0x11f   : > { %6412 = vmatmul.mubr.msk.bf16.gmra.mrb[28].mxu0 %vm547_vm1, %v8230_v56 }
 0x120   : > { %6415 = vmatprep.mubr.msk.bf16.mxu0 %vm547_vm1, %v8236_v23 }
 0x124   : > { %6492 = vmatmul.mubr.msk.bf16.gmra.mrb[32].mxu1 %vm547_vm1, %v8243_v3 }
 0x125   : > { %6497 = vmatprep.mubr.msk.bf16.mxu1 %vm547_vm1, %v7968_v58 }
 0x127   : > { %6416 = vmatmul.mubr.msk.bf16.gmra.mrb[32].mxu0 %vm547_vm1, %v8248_v44 }
 0x128   : > { %6421 = vmatprep.mubr.msk.bf16.mxu0 %vm547_vm1, %v7968_v58 }
 0x12c   : > { %6498 = vmatmul.mubr.msk.bf16.vlgmr.msra.gmra.mrb[36].mxu1 %vm547_vm1, %v7990_v43 }
 0x12d   : > { %6534 = vmatpush3.bf16.msra.mxu1 %v2748_v26  ;;  %6501 = vmatprep.mubr.msk.bf16.mxu1 %vm547_vm1, %v7999_v55  ;;  %v3426_v26 = vsel %vm602_vm0, %v2928_v4, 0 }
 0x12e   : > { %7278 = vmatprep.subr.msk.bf16.mxu1 %vm602_vm0, %v2931_v46  ;;  %v2945_v46 = vrot.slane %v7971_v19, 2  ;;  %v2949_v19 = vrot.slane %v8002_v59, 2  ;;  %v2953_v59 = vrot.slane %v8044_v33, 2  ;;  %v2957_v33 = vrot.slane %v8076_v14, 2 }
 0x12f   : > { %6422 = vmatmul.mubr.msk.bf16.vlgmr.msra.gmra.mrb[0].mxu0 %vm547_vm1, %v7990_v43 }
 0x130   : > { %6610 = vmatpush3.bf16.msra.mxu0 %v3246_v27  ;;  %6425 = vmatprep.mubr.msk.bf16.mxu0 %vm547_vm1, %v7999_v55 }
 0x131   : > { %7280 = vmatprep.subr.msk.bf16.mxu0 %vm602_vm0, %v2928_v4  ;;  %v2959_v4 = vrot.slane %v8102_v63, 2  ;;  %v2965_v63 = vrot.slane %v9336_v61, 2 }
 0x133   : > { %v2960_v14 = vsel %vm2935_vm5, %v2957_v33, %v2959_v4 }
 0x134   : > { %6502 = vmatmul.mubr.msk.bf16.gmra.mrb[40].mxu1 %vm547_vm1, %v8032_v22 }
 0x135   : > { %6505 = vmatprep.mubr.msk.bf16.mxu1 %vm547_vm1, %v8041_v5 }
 0x137   : > { %6426 = vmatmul.mubr.msk.bf16.gmra.mrb[4].mxu0 %vm547_vm1, %v8032_v22 }
 0x138   : > { %6429 = vmatprep.mubr.msk.bf16.mxu0 %vm547_vm1, %v8041_v5 }
 0x13c   : > { %6506 = vmatmul.mubr.msk.bf16.gmra.mrb[44].mxu1 %vm547_vm1, %v8066_v20 }
 0x13d   : > { %6509 = vmatprep.mubr.msk.bf16.mxu1 %vm547_vm1, %v8073_v45 }
 0x13f   : > { %6430 = vmatmul.mubr.msk.bf16.gmra.mrb[8].mxu0 %vm547_vm1, %v8066_v20 }
 0x140   : > { %6433 = vmatprep.mubr.msk.bf16.mxu0 %vm547_vm1, %v8073_v45 }
 0x144   : > { %6510 = vmatmul.mubr.msk.bf16.gmra.mrb[48].mxu1 %vm547_vm1, %v8098_v47 }
 0x145   : > { %6513 = vmatprep.mubr.msk.bf16.mxu1 %vm547_vm1, %v8105_v0 }
 0x147   : > { %6434 = vmatmul.mubr.msk.bf16.gmra.mrb[12].mxu0 %vm547_vm1, %v8098_v47 }
 0x148   : > { %6437 = vmatprep.mubr.msk.bf16.mxu0 %vm547_vm1, %v8105_v0 }
 0x14c   : > { %6514 = vmatmul.mubr.msk.bf16.gmra.mrb[52].mxu1 %vm547_vm1, %v8130_v57 }
 0x14d   : > { %6517 = vmatprep.mubr.msk.bf16.mxu1 %vm547_vm1, %v8137_v18 }
 0x14f   : > { %6438 = vmatmul.mubr.msk.bf16.gmra.mrb[16].mxu0 %vm547_vm1, %v8130_v57 }
 0x150   : > { %6441 = vmatprep.mubr.msk.bf16.mxu0 %vm547_vm1, %v8137_v18 }
 0x154   : > { %6518 = vmatmul.mubr.msk.bf16.gmra.mrb[56].mxu1 %vm547_vm1, %v8162_v52 }
 0x155   : > { %6521 = vmatprep.mubr.msk.bf16.mxu1 %vm547_vm1, %v8169_v16 }
 0x157   : > { %6442 = vmatmul.mubr.msk.bf16.gmra.mrb[20].mxu0 %vm547_vm1, %v8162_v52 }
 0x158   : > { %6445 = vmatprep.mubr.msk.bf16.mxu0 %vm547_vm1, %v8169_v16 }
 0x15c   : > { %6522 = vmatmul.mubr.msk.bf16.gmra.mrb[60].mxu1 %vm547_vm1, %v8194_v35 }
 0x15d   : > { %6525 = vmatprep.mubr.msk.bf16.mxu1 %vm547_vm1, %v8201_v39 }
 0x15f   : > { %6446 = vmatmul.mubr.msk.bf16.gmra.mrb[24].mxu0 %vm547_vm1, %v8194_v35 }
 0x160   : > { %6449 = vmatprep.mubr.msk.bf16.mxu0 %vm547_vm1, %v8201_v39 }
 0x164   : > { %6526 = vmatmul.mubr.msk.bf16.gmra.mrb[64].mxu1 %vm547_vm1, %v8221_v1 }
 0x165   : > { %6529 = vmatprep.mubr.msk.bf16.mxu1 %vm547_vm1, %v8225_v32 }
 0x167   : > { %6450 = vmatmul.mubr.msk.bf16.gmra.mrb[28].mxu0 %vm547_vm1, %v8221_v1 }
 0x168   : > { %6453 = vmatprep.mubr.msk.bf16.mxu0 %vm547_vm1, %v8225_v32 }
 0x16c   : > { %6530 = vmatmul.mubr.msk.bf16.gmra.mrb[68].mxu1 %vm547_vm1, %v8243_v3 }
 0x16d   : > { %6535 = vmatprep.mubr.msk.bf16.mxu1 %vm547_vm1, %v7978_v28  ;;  %v8348_v28 = vsel %vm2935_vm5, %v2937_v42, %v2939_v6 }
 0x16f   : > { %6454 = vmatmul.mubr.msk.bf16.gmra.mrb[32].mxu0 %vm547_vm1, %v8243_v3 }
 0x170   : > { %6611 = vmatprep.mubr.msk.bf16.mxu0 %vm547_vm1, %v8334_v12 }
 0x174   : > { %6536 = vmatmul.mubr.msk.bf16.vlgmr.msra.gmra.mrb[36].mxu1 %vm547_vm1, %v8009_v62  ;;  %v2943_v62 = vrot.slane %v7965_v53, 2  ;;  %v2947_v53 = vrot.slane %v7994_v51, 2  ;;  %v2951_v51 = vrot.slane %v8036_v38, 2  ;;  %v2955_v38 = vrot.slane %v8070_v36, 2 }
 0x175   : > { %6572 = vmatpush3.bf16.msra.mxu1 %v3028_v24  ;;  %6539 = vmatprep.mubr.msk.bf16.mxu1 %vm547_vm1, %v8016_v2  ;;  %v2961_v36 = vrot.slane %v8108_v11, 2 }
 0x176   : > { %7281 = vmatprep.subr.msk.bf16.mxu1 %vm602_vm0, %v8343_v41  ;;  %v8371_v2 = vsel %vm2935_vm5, %v2941_v29, %v2943_v62  ;;  %v8376_v27 = vsel %vm2935_vm5, %v2943_v62, %v2945_v46 }
 0x177   : > { %6612 = vmatmul.mubr.msk.bf16.vlgmr.msra.gmra.mrb[36].mxu0 %vm547_vm1, %v8348_v28 }
 0x178   : > { %6648 = vmatpush3.bf16.msra.mxu0 %v3426_v26  ;;  %6615 = vmatprep.mubr.msk.bf16.mxu0 %vm547_vm1, %v8354_v50 }
 0x179   : > { %7283 = vmatprep.subr.msk.bf16.mxu0 %vm602_vm0, %v8358_v8 }
 0x17c   : > { %6540 = vmatmul.mubr.msk.bf16.gmra.mrb[40].mxu1 %vm547_vm1, %v8049_v37  ;;  %v8387_v37 = vsel %vm2935_vm5, %v2945_v46, %v2947_v53 }
 0x17d   : > { %6543 = vmatprep.mubr.msk.bf16.mxu1 %vm547_vm1, %v8054_v54  ;;  %v8392_v54 = vsel %vm2935_vm5, %v2947_v53, %v2949_v19 }
 0x17f   : > { %6616 = vmatmul.mubr.msk.bf16.gmra.mrb[40].mxu0 %vm547_vm1, %v8371_v2 }
 0x180   : > { %6619 = vmatprep.mubr.msk.bf16.mxu0 %vm547_vm1, %v8376_v27 }
 0x184   : > { %6544 = vmatmul.mubr.msk.bf16.gmra.mrb[44].mxu1 %vm547_vm1, %v8081_v10  ;;  %v8403_v10 = vsel %vm2935_vm5, %v2949_v19, %v2951_v51 }
 0x185   : > { %6547 = vmatprep.mubr.msk.bf16.mxu1 %vm547_vm1, %v8086_v34  ;;  %v2954_v34 = vsel %vm2935_vm5, %v2951_v51, %v2953_v59 }
 0x187   : > { %6620 = vmatmul.mubr.msk.bf16.gmra.mrb[44].mxu0 %vm547_vm1, %v8387_v37 }
 0x188   : > { %6623 = vmatprep.mubr.msk.bf16.mxu0 %vm547_vm1, %v8392_v54 }
 0x18c   : > { %6548 = vmatmul.mubr.msk.bf16.gmra.mrb[48].mxu1 %vm547_vm1, %v8113_v13  ;;  %v2956_v13 = vsel %vm2935_vm5, %v2953_v59, %v2955_v38 }
 0x18d   : > { %6551 = vmatprep.mubr.msk.bf16.mxu1 %vm547_vm1, %v8118_v21  ;;  %v2958_v21 = vsel %vm2935_vm5, %v2955_v38, %v2957_v33 }
 0x18f   : > { %6624 = vmatmul.mubr.msk.bf16.gmra.mrb[48].mxu0 %vm547_vm1, %v8403_v10 }
 0x190   : > { %6627 = vmatprep.mubr.msk.bf16.mxu0 %vm547_vm1, %v2954_v34 }
 0x194   : > { %6552 = vmatmul.mubr.msk.bf16.gmra.mrb[52].mxu1 %vm547_vm1, %v8145_v49  ;;  %v2962_v49 = vsel %vm2935_vm5, %v2959_v4, %v2961_v36 }
 0x195   : > { %6555 = vmatprep.mubr.msk.bf16.mxu1 %vm547_vm1, %v8150_v30  ;;  %v2963_v30 = vrot.slane %v8134_v15, 2  ;;  %v2969_v15 = vrot.slane %v8172_v9, 2  ;;  %v3829_v9 = vsel %vm602_vm0, %v8343_v41, 0 }
 0x197   : > { %6628 = vmatmul.mubr.msk.bf16.gmra.mrb[52].mxu0 %vm547_vm1, %v2956_v13  ;;  %v2964_v11 = vsel %vm2935_vm5, %v2961_v36, %v2963_v30 }
 0x198   : > { %6631 = vmatprep.mubr.msk.bf16.mxu0 %vm547_vm1, %v2958_v21 }
 0x19c   : > { %6556 = vmatmul.mubr.msk.bf16.gmra.mrb[56].mxu1 %vm547_vm1, %v8177_v31  ;;  %v2966_v31 = vsel %vm2935_vm5, %v2963_v30, %v2965_v63 }
 0x19d   : > { %6559 = vmatprep.mubr.msk.bf16.mxu1 %vm547_vm1, %v8182_v48  ;;  %v2967_v48 = vrot.slane %v8166_v7, 2  ;;  %v8455_v7 = vsel %vm2935_vm5, %v2969_v15, %v2971_v40  ;;  %v8606_v40 = vld [vmem:[%s7613_s28 + $0x48] sm:$0xff]  }
 0x19f   : > { %6632 = vmatmul.mubr.msk.bf16.gmra.mrb[56].mxu0 %vm547_vm1, %v2960_v14 }
 0x1a0   : > { %6635 = vmatprep.mubr.msk.bf16.mxu0 %vm547_vm1, %v2962_v49 }
 0x1a4   : > { %6560 = vmatmul.mubr.msk.bf16.gmra.mrb[60].mxu1 %vm547_vm1, %v8206_v25  ;;  %v2968_v25 = vsel %vm2935_vm5, %v2965_v63, %v2967_v48 }
 0x1a5   : > { %6563 = vmatprep.mubr.msk.bf16.mxu1 %vm547_vm1, %v8211_v60  ;;  %v2970_v60 = vsel %vm2935_vm5, %v2967_v48, %v2969_v15 }
 0x1a7   : > { %6636 = vmatmul.mubr.msk.bf16.gmra.mrb[60].mxu0 %vm547_vm1, %v2964_v11 }
 0x1a8   : > { %6639 = vmatprep.mubr.msk.bf16.mxu0 %vm547_vm1, %v2966_v31 }
 0x1ac   : > { %6564 = vmatmul.mubr.msk.bf16.gmra.mrb[64].mxu1 %vm547_vm1, %v8230_v56  ;;  %v8465_v56 = vld [vmem:[#allocation2 + $0x16] sm:$0x3] }
 0x1ad   : > { %6567 = vmatprep.mubr.msk.bf16.mxu1 %vm547_vm1, %v8236_v23  ;;  %v4494_v23 = vsel %vm602_vm0, %v8358_v8, 0  ;;  %v4276_v33 = vsel %vm602_vm0, %v8465_v56, 0 }
 0x1af   : > { %6640 = vmatmul.mubr.msk.bf16.gmra.mrb[64].mxu0 %vm547_vm1, %v2968_v25 }
 0x1b0   : > { %6643 = vmatprep.mubr.msk.bf16.mxu0 %vm547_vm1, %v2970_v60 }
 0x1b4   : > { %6568 = vmatmul.mubr.msk.bf16.gmra.mrb[68].mxu1 %vm547_vm1, %v8248_v44  ;;  %v8475_v44 = vld [vmem:[#allocation2 + $0x1e] sm:$0x3] }
 0x1b5   : > { %6573 = vmatprep.mubr.msk.bf16.mxu1 %vm547_vm1, %v8334_v12  ;;  %v4808_v63 = vsel %vm602_vm0, %v8475_v44, 0 }
 0x1b7   : > { %6644 = vmatmul.mubr.msk.bf16.gmra.mrb[68].mxu0 %vm547_vm1, %v8455_v7 }
 0x1b8   : > { %6649 = vmatprep.mubr.msk.bf16.mxu0 %vm547_vm1, %v7968_v58  ;;  %v3605_v58 = vld [vmem:[%s7613_s28 + $0x10] sm:$0xc] }
 0x1bc   : > { %6574 = vmatmul.mubr.msk.bf16.vlgmr.msra.gmra.mrb[0].mxu1 %vm547_vm1, %v8348_v28 }
 0x1bd   : > { %6686 = vmatpush3.bf16.msra.mxu1 %v3829_v9  ;;  %6577 = vmatprep.mubr.msk.bf16.mxu1 %vm547_vm1, %v8354_v50  ;;  %v8553_v50 = vld [vmem:[%s7613_s28 + $0x30] sm:$0xff]  }
 0x1be   : > { %7282 = vmatprep.subr.msk.bf16.mxu1 %vm602_vm0, %v8465_v56  ;;  %v4087_v19 = vshrl.u32 %v8553_v50, 16 }
 0x1bf   : > { %6650 = vmatmul.mubr.msk.bf16.vlgmr.msra.gmra.mrb[36].mxu0 %vm547_vm1, %v7990_v43  ;;  %v8520_v43 = vld [vmem:[%s7613_s28 + $0x14] sm:$0xf] }
 0x1c0   : > { %6762 = vmatpush3.bf16.msra.mxu0 %v4494_v23  ;;  %6653 = vmatprep.mubr.msk.bf16.mxu0 %vm547_vm1, %v7999_v55  ;;  %v5721_v55 = vcombine.low %v3605_v58, %v8520_v43  ;;  %v4089_v36 = vrot.slane %v4087_v19, 2 }
 0x1c1   : > { %7284 = vmatprep.subr.msk.bf16.mxu0 %vm602_vm0, %v8475_v44 }
 0x1c4   : > { %6578 = vmatmul.mubr.msk.bf16.gmra.mrb[4].mxu1 %vm547_vm1, %v8371_v2 }
 0x1c5   : > { %6581 = vmatprep.mubr.msk.bf16.mxu1 %vm547_vm1, %v8376_v27  ;;  %v8563_v27 = vld [vmem:[%s7613_s28 + $0x38] sm:$0xff]  }
 0x1c6   : > { %v4099_v38 = vshll.u32 %v8563_v27, 16  ;;  %v3746_v9 = vrot.slane %v8563_v27, 2 }
 0x1c7   : > { %6654 = vmatmul.mubr.msk.bf16.gmra.mrb[40].mxu0 %vm547_vm1, %v8032_v22  ;;  %v8526_v22 = vld [vmem:[%s7613_s28 + $0x18] sm:$0xff]  }
 0x1c8   : > { %6657 = vmatprep.mubr.msk.bf16.mxu0 %vm547_vm1, %v8041_v5  ;;  %v4052_v5 = vshrl.u32 %v5721_v55, 16  ;;  %v3738_v42 = vrot.slane %v8526_v22, 2  ;;  %v4101_v17 = vrot.slane %v4099_v38, 3 }
 0x1cc   : > { %6582 = vmatmul.mubr.msk.bf16.gmra.mrb[8].mxu1 %vm547_vm1, %v8387_v37  ;;  %v4090_v37 = vshll.u32 %v8553_v50, 16 }
 0x1cd   : > { %6585 = vmatprep.mubr.msk.bf16.mxu1 %vm547_vm1, %v8392_v54  ;;  %v8571_v54 = vld [vmem:[#allocation4] ss:$0 sm:$0xff] }
 0x1cf   : > { %6658 = vmatmul.mubr.msk.bf16.gmra.mrb[44].mxu0 %vm547_vm1, %v8066_v20  ;;  %v4055_v20 = vshll.u32 %v5721_v55, 16 }
 0x1d0   : > { %6661 = vmatprep.mubr.msk.bf16.mxu0 %vm547_vm1, %v8073_v45  ;;  %v4060_v45 = vshrl.u32 %v8526_v22, 16 }
 0x1d4   : > { %6586 = vmatmul.mubr.msk.bf16.gmra.mrb[12].mxu1 %vm547_vm1, %v8403_v10 }
 0x1d5   : > { %6589 = vmatprep.mubr.msk.bf16.mxu1 %vm547_vm1, %v2954_v34  ;;  %v4096_v34 = vshrl.u32 %v8563_v27, 16 }
 0x1d7   : > { %6662 = vmatmul.mubr.msk.bf16.gmra.mrb[48].mxu0 %vm547_vm1, %v8098_v47  ;;  %v4063_v47 = vshll.u32 %v8526_v22, 16 }
 0x1d8   : > { %6665 = vmatprep.mubr.msk.bf16.mxu0 %vm547_vm1, %v8105_v0  ;;  %v8536_v0 = vld [vmem:[%s7613_s28 + $0x20] sm:$0xff]  }
 0x1d9   : > { %v4069_v12 = vshrl.u32 %v8536_v0, 16  ;;  %v4072_v6 = vshll.u32 %v8536_v0, 16  ;;  %v3740_v8 = vrot.slane %v8536_v0, 2 }
 0x1db   : > { %v3741_v59 = vsel %vm2935_vm5, %v3738_v42, %v3740_v8 }
 0x1dc   : > { %6590 = vmatmul.mubr.msk.bf16.gmra.mrb[16].mxu1 %vm547_vm1, %v2956_v13 }
 0x1dd   : > { %6593 = vmatprep.mubr.msk.bf16.mxu1 %vm547_vm1, %v2958_v21 }
 0x1df   : > { %6666 = vmatmul.mubr.msk.bf16.gmra.mrb[52].mxu0 %vm547_vm1, %v8130_v57  ;;  %v4054_v57 = vrot.slane %v4052_v5, 2  ;;  %v4114_v5 = vshrl.u32 %v8606_v40, 16 }
 0x1e0   : > { %6669 = vmatprep.mubr.msk.bf16.mxu0 %vm547_vm1, %v8137_v18  ;;  %v4057_v18 = vrot.slane %v4055_v20, 3  ;;  %v4117_v20 = vshll.u32 %v8606_v40, 16 }
 0x1e2   : > { %v4058_v29 = vor.u32 %v4057_v18, %v4054_v57 }
 0x1e4   : > { %6594 = vmatmul.mubr.msk.bf16.gmra.mrb[20].mxu1 %vm547_vm1, %v2960_v14  ;;  %v4092_v14 = vrot.slane %v4090_v37, 3 }
 0x1e5   : > { %6597 = vmatprep.mubr.msk.bf16.mxu1 %vm547_vm1, %v2962_v49 }
 0x1e6   : > { %v4093_v56 = vor.u32 %v4092_v14, %v4089_v36 }
 0x1e7   : > { %6670 = vmatmul.mubr.msk.bf16.gmra.mrb[56].mxu0 %vm547_vm1, %v8162_v52  ;;  %v4062_v52 = vrot.slane %v4060_v45, 2 }
 0x1e8   : > { %6673 = vmatprep.mubr.msk.bf16.mxu0 %vm547_vm1, %v8169_v16  ;;  %v4065_v16 = vrot.slane %v4063_v47, 3 }
 0x1ea   : > { %v4066_v24 = vor.u32 %v4065_v16, %v4062_v52  ;;  %v8631_v16 = vld [vmem:[%s7613_s28 + $0x50] sm:$0xff]  }
 0x1ec   : > { %6598 = vmatmul.mubr.msk.bf16.gmra.mrb[24].mxu1 %vm547_vm1, %v2964_v11  ;;  %v8560_v62 = vsel %vm4050_vm6, %v4058_v29, %v4066_v24  ;;  %v3744_v11 = vrot.slane %v8553_v50, 2 }
 0x1ed   : > { %6601 = vmatprep.mubr.msk.bf16.mxu1 %vm547_vm1, %v2966_v31  ;;  %v8596_v31 = vld [vmem:[%s7613_s28 + $0x40] sm:$0xff]  }
 0x1ee   : > { %v4105_v23 = vshrl.u32 %v8596_v31, 16  ;;  %v4108_v44 = vshll.u32 %v8596_v31, 16  ;;  %v3747_v47 = vsel %vm2935_vm5, %v3744_v11, %v3746_v9 }
 0x1ef   : > { %6674 = vmatmul.mubr.msk.bf16.gmra.mrb[60].mxu0 %vm547_vm1, %v8194_v35  ;;  %v8540_v35 = vld [vmem:[%s7613_s28 + $0x28] sm:$0xff]  }
 0x1f0   : > { %6677 = vmatprep.mubr.msk.bf16.mxu0 %vm547_vm1, %v8201_v39  ;;  %v3737_v39 = vrot.slane %v5721_v55, 2  ;;  %v4078_v41 = vshrl.u32 %v8540_v35, 16  ;;  %v4081_v28 = vshll.u32 %v8540_v35, 16  ;;  %v3742_v53 = vrot.slane %v8540_v35, 2 }
 0x1f1   : > { %v4110_v29 = vrot.slane %v4108_v44, 3 }
 0x1f2   : > { %v3739_v26 = vsel %vm2935_vm5, %v3737_v39, %v3738_v42  ;;  %v4080_v46 = vrot.slane %v4078_v41, 2  ;;  %v4083_v2 = vrot.slane %v4081_v28, 3  ;;  %v3743_v13 = vsel %vm2935_vm5, %v3740_v8, %v3742_v53 }
 0x1f3   : > { %v3745_v58 = vsel %vm2935_vm5, %v3742_v53, %v3744_v11  ;;  %v4126_v53 = vshll.u32 %v8631_v16, 16 }
 0x1f4   : > { %6602 = vmatmul.mubr.msk.bf16.gmra.mrb[28].mxu1 %vm547_vm1, %v2968_v25  ;;  %v4084_v10 = vor.u32 %v4083_v2, %v4080_v46  ;;  %v3750_v46 = vrot.slane %v8606_v40, 2  ;;  %v4123_v2 = vshrl.u32 %v8631_v16, 16 }
 0x1f5   : > { %6605 = vmatprep.mubr.msk.bf16.mxu1 %vm547_vm1, %v2970_v60  ;;  %v4098_v60 = vrot.slane %v4096_v34, 2 }
 0x1f6   : > { %v8628_v52 = vsel %vm4050_vm6, %v4084_v10, %v4093_v56 }
 0x1f7   : > { %6678 = vmatmul.mubr.msk.bf16.gmra.mrb[64].mxu0 %vm547_vm1, %v8221_v1  ;;  %v4074_v1 = vrot.slane %v4072_v6, 3  ;;  %v4102_v55 = vor.u32 %v4101_v17, %v4098_v60  ;;  %v4107_v6 = vrot.slane %v4105_v23, 2  ;;  %v8682_v17 = vld [vmem:[%s7613_s28 + $0x68] sm:$0xff]  }
 0x1f8   : > { %6681 = vmatprep.mubr.msk.bf16.mxu0 %vm547_vm1, %v8225_v32  ;;  %v4071_v32 = vrot.slane %v4069_v12, 2  ;;  %v3748_v12 = vrot.slane %v8596_v31, 2 }
 0x1f9   : > { %v8641_v28 = vsel %vm4050_vm6, %v4093_v56, %v4102_v55  ;;  %v4111_v19 = vor.u32 %v4110_v29, %v4107_v6 }
 0x1fa   : > { %v4075_v51 = vor.u32 %v4074_v1, %v4071_v32  ;;  %v4119_v32 = vrot.slane %v4117_v20, 3  ;;  %v8644_v1 = vld [vmem:[%s7613_s28 + $0x58] sm:$0xff]   ;;  %v3749_v37 = vsel %vm2935_vm5, %v3746_v9, %v3748_v12  ;;  %v3751_v38 = vsel %vm2935_vm5, %v3748_v12, %v3750_v46 }
 0x1fb   : > { %v8668_v14 = vsel %vm4050_vm6, %v4102_v55, %v4111_v19  ;;  %v3754_v9 = vrot.slane %v8644_v1, 2  ;;  %v4153_v20 = vshll.u32 %v8682_v17, 16 }
 0x1fc   : > { %6606 = vmatmul.mubr.msk.bf16.gmra.mrb[32].mxu1 %vm547_vm1, %v8455_v7  ;;  %v8590_v61 = vsel %vm4050_vm6, %v4066_v24, %v4075_v51  ;;  %v8603_v25 = vsel %vm4050_vm6, %v4075_v51, %v4084_v10  ;;  %v4135_v10 = vshll.u32 %v8644_v1, 16 }
 0x1fd   : > { %6687 = vmatprep.mubr.msk.bf16.mxu1 %vm547_vm1, %v3739_v26  ;;  %v4116_v26 = vrot.slane %v4114_v5, 2  ;;  %v4150_v5 = vshrl.u32 %v8682_v17, 16 }
 0x1fe   : > { %v4137_v60 = vrot.slane %v4135_v10, 3 }
 0x1ff   : > { %6682 = vmatmul.mubr.msk.bf16.gmra.mrb[68].mxu0 %vm547_vm1, %v8243_v3  ;;  %v4120_v51 = vor.u32 %v4119_v32, %v4116_v26 }
 0x200   : > { %6763 = vmatprep.mubr.msk.bf16.mxu0 %vm547_vm1, %v8560_v62 }
 0x202   : > { %v6423_v3 = vpop.f32.mrb[0].mxu0 }
 0x203   : > { %v5032_v21 = vadd.f32 %v6423_v3, %v8571_v54  ;;  %v2168_v4 = vpop.f32.mrb[1].mxu0 }
 0x204   : > { %v5030_v49 = vadd.f32 %v8571_v54, %v2168_v4  ;;  %6688 = vmatmul.mubr.msk.bf16.vlgmr.msra.gmra.mrb[36].mxu1 %vm547_vm1, %v3741_v59  ;;  %v6424_v30 = vpop.f32.mrb[2].mxu0  ;;  %v4132_v59 = vshrl.u32 %v8644_v1, 16 }
 0x205   : > { %5068 = vst.msk [vmem:[%s8581_s30 + $0x10] sm:$0xff] %vm547_vm1, %v5032_v21  ;;  %v5033_v48 = vadd.f32 %v6424_v30, %v8571_v54  ;;  %v2171_v15 = vpop.f32.mrb[3].mxu0  ;;  %6724 = vmatpush3.bf16.msra.mxu1 %v4276_v33  ;;  %6691 = vmatprep.mubr.msk.bf16.mxu1 %vm547_vm1, %v3743_v13  ;;  %v4125_v13 = vrot.slane %v4123_v2, 2  ;;  %v4128_v21 = vrot.slane %v4126_v53, 3  ;;  %v8672_v30 = vld [vmem:[%s7613_s28 + $0x60] sm:$0xff]   ;;  %v4155_v2 = vrot.slane %v4153_v20, 3 }
 0x206   : > { %5066 = vst.msk [vmem:[%s8581_s30] sm:$0xff] %vm547_vm1, %v5030_v49  ;;  %v5031_v7 = vadd.f32 %v8571_v54, %v2171_v15  ;;  %v3752_v49 = vrot.slane %v8631_v16, 2  ;;  %v4134_v15 = vrot.slane %v4132_v59, 2  ;;  %v4141_v23 = vshrl.u32 %v8672_v30, 16  ;;  %v8720_v53 = vld [vmem:[%s7613_s28 + $0x78] sm:$0xff]   ;;  %v8758_v20 = vld [vmem:[%s7613_s28 + $0x88] sm:$0xff]  }
 0x207   : > { %5069 = vst.msk [vmem:[%s8581_s30 + $0x18] sm:$0xff] %vm547_vm1, %v5033_v48  ;;  %6764 = vmatmul.mubr.msk.bf16.vlgmr.msra.gmra.mrb[36].mxu0 %vm547_vm1, %v8590_v61  ;;  %v8679_v48 = vsel %vm4050_vm6, %v4111_v19, %v4120_v51  ;;  %v4129_v56 = vor.u32 %v4128_v21, %v4125_v13  ;;  %v4144_v44 = vshll.u32 %v8672_v30, 16  ;;  %v3756_v29 = vrot.slane %v8672_v30, 2 }
 0x208   : > { %5067 = vst.msk [vmem:[%s8581_s30 + $0x8] sm:$0xff] %vm547_vm1, %v5031_v7  ;;  %6800 = vmatpush3.bf16.msra.mxu0 %v4808_v63  ;;  %6767 = vmatprep.mubr.msk.bf16.mxu0 %vm547_vm1, %v8603_v25  ;;  %v4138_v55 = vor.u32 %v4137_v60, %v4134_v15 }
 0x20a   : > { %v6427_v45 = vpop.f32.mrb[4].mxu0 }
 0x20b   : > { %v5036_v57 = vadd.f32 %v6427_v45, %v8571_v54  ;;  %v2184_v18 = vpop.f32.mrb[5].mxu0 }
 0x20c   : > { %v5034_v39 = vadd.f32 %v8571_v54, %v2184_v18  ;;  %6692 = vmatmul.mubr.msk.bf16.gmra.mrb[40].mxu1 %vm547_vm1, %v3745_v58  ;;  %v6428_v42 = vpop.f32.mrb[6].mxu0  ;;  %v3753_v58 = vsel %vm2935_vm5, %v3750_v46, %v3752_v49  ;;  %v4152_v46 = vrot.slane %v4150_v5, 2 }
 0x20d   : > { %5072 = vst.msk [vmem:[%s8581_s30 + $0x30] sm:$0xff] %vm547_vm1, %v5036_v57  ;;  %v5037_v24 = vadd.f32 %v6428_v42, %v8571_v54  ;;  %v2187_v41 = vpop.f32.mrb[7].mxu0  ;;  %6695 = vmatprep.mubr.msk.bf16.mxu1 %vm547_vm1, %v3747_v47  ;;  %v3755_v47 = vsel %vm2935_vm5, %v3752_v49, %v3754_v9  ;;  %v8707_v42 = vld [vmem:[%s7613_s28 + $0x70] sm:$0xff]  }
 0x20e   : > { %5070 = vst.msk [vmem:[%s8581_s30 + $0x20] sm:$0xff] %vm547_vm1, %v5034_v39  ;;  %v5035_v8 = vadd.f32 %v8571_v54, %v2187_v41  ;;  %v8704_v39 = vsel %vm4050_vm6, %v4120_v51, %v4129_v56  ;;  %v4146_v41 = vrot.slane %v4144_v44, 3  ;;  %v4159_v51 = vshrl.u32 %v8707_v42, 16 }
 0x20f   : > { %5073 = vst.msk [vmem:[%s8581_s30 + $0x38] sm:$0xff] %vm547_vm1, %v5037_v24  ;;  %6768 = vmatmul.mubr.msk.bf16.gmra.mrb[40].mxu0 %vm547_vm1, %v8628_v52  ;;  %v4143_v24 = vrot.slane %v4141_v23, 2  ;;  %v4162_v59 = vshll.u32 %v8707_v42, 16 }
 0x210   : > { %5071 = vst.msk [vmem:[%s8581_s30 + $0x28] sm:$0xff] %vm547_vm1, %v5035_v8  ;;  %6771 = vmatprep.mubr.msk.bf16.mxu0 %vm547_vm1, %v8641_v28  ;;  %v8717_v8 = vsel %vm4050_vm6, %v4129_v56, %v4138_v55  ;;  %v4161_v49 = vrot.slane %v4159_v51, 2 }
 0x211   : > { %v4147_v10 = vor.u32 %v4146_v41, %v4143_v24  ;;  %v4189_v24 = vshll.u32 %v8758_v20, 16 }
 0x212   : > { %v6431_v34 = vpop.f32.mrb[8].mxu0 }
 0x213   : > { %v5040_v3 = vadd.f32 %v6431_v34, %v8571_v54  ;;  %v2200_v33 = vpop.f32.mrb[9].mxu0  ;;  %v3757_v34 = vsel %vm2935_vm5, %v3754_v9, %v3756_v29  ;;  %v8744_v60 = vsel %vm4050_vm6, %v4138_v55, %v4147_v10  ;;  %v8748_v9 = vld [vmem:[%s7613_s28 + $0x80] sm:$0xff]  }
 0x214   : > { %v5038_v4 = vadd.f32 %v8571_v54, %v2200_v33  ;;  %6696 = vmatmul.mubr.msk.bf16.gmra.mrb[44].mxu1 %vm547_vm1, %v3749_v37  ;;  %v6432_v36 = vpop.f32.mrb[10].mxu0  ;;  %v3758_v37 = vrot.slane %v8682_v17, 2  ;;  %v4171_v33 = vshll.u32 %v8720_v53, 16  ;;  %v3764_v51 = vrot.slane %v8748_v9, 2 }
 0x215   : > { %5076 = vst.msk [vmem:[%s8581_s30 + $0x50] sm:$0xff] %vm547_vm1, %v5040_v3  ;;  %v5041_v63 = vadd.f32 %v6432_v36, %v8571_v54  ;;  %v2203_v11 = vpop.f32.mrb[11].mxu0  ;;  %6699 = vmatprep.mubr.msk.bf16.mxu1 %vm547_vm1, %v3751_v38  ;;  %v4156_v38 = vor.u32 %v4155_v2, %v4152_v46  ;;  %v4168_v3 = vshrl.u32 %v8720_v53, 16 }
 0x216   : > { %5074 = vst.msk [vmem:[%s8581_s30 + $0x40] sm:$0xff] %vm547_vm1, %v5038_v4  ;;  %v5039_v7 = vadd.f32 %v8571_v54, %v2203_v11  ;;  %v3759_v21 = vsel %vm2935_vm5, %v3756_v29, %v3758_v37  ;;  %v4173_v5 = vrot.slane %v4171_v33, 3  ;;  %v4186_v29 = vshrl.u32 %v8758_v20, 16 }
 0x217   : > { %5077 = vst.msk [vmem:[%s8581_s30 + $0x58] sm:$0xff] %vm547_vm1, %v5041_v63  ;;  %6772 = vmatmul.mubr.msk.bf16.gmra.mrb[44].mxu0 %vm547_vm1, %v8668_v14  ;;  %v4164_v63 = vrot.slane %v4162_v59, 3  ;;  %v8755_v44 = vsel %vm4050_vm6, %v4147_v10, %v4156_v38 }
 0x218   : > { %5075 = vst.msk [vmem:[%s8581_s30 + $0x48] sm:$0xff] %vm547_vm1, %v5039_v7  ;;  %6775 = vmatprep.mubr.msk.bf16.mxu0 %vm547_vm1, %v8679_v48  ;;  %v3760_v7 = vrot.slane %v8707_v42, 2 }
 0x21a   : > { %v6435_v45 = vpop.f32.mrb[12].mxu0 }
 0x21b   : > { %v5044_v57 = vadd.f32 %v6435_v45, %v8571_v54  ;;  %v2216_v18 = vpop.f32.mrb[13].mxu0  ;;  %v3762_v45 = vrot.slane %v8720_v53, 2 }
 0x21c   : > { %v5042_v12 = vadd.f32 %v8571_v54, %v2216_v18  ;;  %6700 = vmatmul.mubr.msk.bf16.gmra.mrb[48].mxu1 %vm547_vm1, %v3753_v58  ;;  %v6436_v6 = vpop.f32.mrb[14].mxu0  ;;  %v4170_v58 = vrot.slane %v4168_v3, 2  ;;  %v4180_v18 = vshll.u32 %v8748_v9, 16 }
 0x21d   : > { %5080 = vst.msk [vmem:[%s8581_s30 + $0x70] sm:$0xff] %vm547_vm1, %v5044_v57  ;;  %v5045_v26 = vadd.f32 %v6436_v6, %v8571_v54  ;;  %v2219_v32 = vpop.f32.mrb[15].mxu0  ;;  %6703 = vmatprep.mubr.msk.bf16.mxu1 %vm547_vm1, %v3755_v47  ;;  %v4165_v47 = vor.u32 %v4164_v63, %v4161_v49  ;;  %v4177_v57 = vshrl.u32 %v8748_v9, 16  ;;  %v3766_v49 = vrot.slane %v8758_v20, 2 }
 0x21e   : > { %5078 = vst.msk [vmem:[%s8581_s30 + $0x60] sm:$0xff] %vm547_vm1, %v5042_v12  ;;  %v5043_v19 = vadd.f32 %v8571_v54, %v2219_v32  ;;  %v3761_v12 = vsel %vm2935_vm5, %v3758_v37, %v3760_v7  ;;  %v4174_v6 = vor.u32 %v4173_v5, %v4170_v58  ;;  %v4182_v10 = vrot.slane %v4180_v18, 3 }
 0x21f   : > { %5081 = vst.msk [vmem:[%s8581_s30 + $0x78] sm:$0xff] %vm547_vm1, %v5045_v26  ;;  %6776 = vmatmul.mubr.msk.bf16.gmra.mrb[48].mxu0 %vm547_vm1, %v8704_v39  ;;  %v3763_v26 = vsel %vm2935_vm5, %v3760_v7, %v3762_v45  ;;  %v8780_v2 = vsel %vm4050_vm6, %v4156_v38, %v4165_v47  ;;  %v4179_v59 = vrot.slane %v4177_v57, 2  ;;  %v3765_v7 = vsel %vm2935_vm5, %v3762_v45, %v3764_v51 }
 0x220   : > { %5079 = vst.msk [vmem:[%s8581_s30 + $0x68] sm:$0xff] %vm547_vm1, %v5043_v19  ;;  %6779 = vmatprep.mubr.msk.bf16.mxu0 %vm547_vm1, %v8717_v8  ;;  %v8793_v33 = vsel %vm4050_vm6, %v4165_v47, %v4174_v6 }
 0x221   : > { %v4183_v63 = vor.u32 %v4182_v10, %v4179_v59 }
 0x222   : > { %v6439_v13 = vpop.f32.mrb[16].mxu0 }
 0x223   : > { %v5048_v4 = vadd.f32 %v6439_v13, %v8571_v54  ;;  %v2232_v36 = vpop.f32.mrb[17].mxu0  ;;  %v4188_v13 = vrot.slane %v4186_v29, 2  ;;  %v8821_v29 = vsel %vm4050_vm6, %v4174_v6, %v4183_v63 }
 0x224   : > { %v5046_v11 = vadd.f32 %v8571_v54, %v2232_v36  ;;  %6704 = vmatmul.mubr.msk.bf16.gmra.mrb[52].mxu1 %vm547_vm1, %v3757_v34  ;;  %v6440_v15 = vpop.f32.mrb[18].mxu0  ;;  %v8786_v34 = vld [vmem:[%s7613_s28 + $0x90] sm:$0xff]  }
 0x225   : > { %5084 = vst.msk [vmem:[%s8581_s30 + $0x90] sm:$0xff] %vm547_vm1, %v5048_v4  ;;  %v5049_v56 = vadd.f32 %v6440_v15, %v8571_v54  ;;  %v2235_v23 = vpop.f32.mrb[19].mxu0  ;;  %6707 = vmatprep.mubr.msk.bf16.mxu1 %vm547_vm1, %v3759_v21  ;;  %v4191_v21 = vrot.slane %v4189_v24, 3  ;;  %v8796_v4 = vld [vmem:[%s7613_s28 + $0x98] sm:$0xff]   ;;  %v4198_v15 = vshll.u32 %v8786_v34, 16  ;;  %v3768_v18 = vrot.slane %v8786_v34, 2 }
 0x226   : > { %5082 = vst.msk [vmem:[%s8581_s30 + $0x80] sm:$0xff] %vm547_vm1, %v5046_v11  ;;  %v5047_v55 = vadd.f32 %v8571_v54, %v2235_v23  ;;  %v4195_v11 = vshrl.u32 %v8786_v34, 16  ;;  %v4204_v23 = vshrl.u32 %v8796_v4, 16  ;;  %v4207_v58 = vshll.u32 %v8796_v4, 16 }
 0x227   : > { %5085 = vst.msk [vmem:[%s8581_s30 + $0x98] sm:$0xff] %vm547_vm1, %v5049_v56  ;;  %6780 = vmatmul.mubr.msk.bf16.gmra.mrb[52].mxu0 %vm547_vm1, %v8744_v60  ;;  %v4192_v56 = vor.u32 %v4191_v21, %v4188_v13  ;;  %v3770_v59 = vrot.slane %v8796_v4, 2  ;;  %v3769_v13 = vsel %vm2935_vm5, %v3766_v49, %v3768_v18  ;;  %v7393_v21 = vld [vmem:[%s7613_s28 + $0xa0] ss:$0 sps:$4 sm:$0x33]  }
 0x228   : > { %5083 = vst.msk [vmem:[%s8581_s30 + $0x88] sm:$0xff] %vm547_vm1, %v5047_v55  ;;  %6783 = vmatprep.mubr.msk.bf16.mxu0 %vm547_vm1, %v8755_v44  ;;  %v3767_v55 = vsel %vm2935_vm5, %v3764_v51, %v3766_v49  ;;  %v4197_v24 = vrot.slane %v4195_v11, 2  ;;  %v4209_v51 = vrot.slane %v4207_v58, 3 }
 0x229   : > { %v3771_v11 = vsel %vm2935_vm5, %v3768_v18, %v3770_v59 }
 0x22a   : > { %v6443_v41 = vpop.f32.mrb[20].mxu0 }
 0x22b   : > { %v5052_v32 = vadd.f32 %v6443_v41, %v8571_v54  ;;  %v2248_v46 = vpop.f32.mrb[21].mxu0  ;;  %v4200_v41 = vrot.slane %v4198_v15, 3  ;;  %v4709_v15 = vld [vmem:[%s7613_s28 + $0x10] sm:$0x8] }
 0x22c   : > { %v5050_v19 = vadd.f32 %v8571_v54, %v2248_v46  ;;  %6708 = vmatmul.mubr.msk.bf16.gmra.mrb[56].mxu1 %vm547_vm1, %v3761_v12  ;;  %v6444_v37 = vpop.f32.mrb[22].mxu0 }
 0x22d   : > { %5088 = vst.msk [vmem:[%s8581_s30 + $0xb0] sm:$0xff] %vm547_vm1, %v5052_v32  ;;  %v5053_v3 = vadd.f32 %v6444_v37, %v8571_v54  ;;  %v2251_v38 = vpop.f32.mrb[23].mxu0  ;;  %6711 = vmatprep.mubr.msk.bf16.mxu1 %vm547_vm1, %v3763_v26  ;;  %v8824_v26 = vld [vmem:[%s7613_s28 + $0xa0] ss:$0 sps:$4 sm:$0x77]   ;;  %v4206_v37 = vrot.slane %v4204_v23, 2  ;;  %v4201_v10 = vor.u32 %v4200_v41, %v4197_v24  ;;  %v5795_v24 = vcombine.low %v4709_v15, %v8520_v43 }
 0x22e   : > { %5086 = vst.msk [vmem:[%s8581_s30 + $0xa0] sm:$0xff] %vm547_vm1, %v5050_v19  ;;  %v5051_v36 = vadd.f32 %v8571_v54, %v2251_v38  ;;  %v8831_v19 = vsel %vm4050_vm6, %v4183_v63, %v4192_v56  ;;  %v4216_v38 = vshll.u32 %v8824_v26, 16  ;;  %v4723_v15 = vrot.slane %v8553_v50, 3 }
 0x22f   : > { %5089 = vst.msk [vmem:[%s8581_s30 + $0xb8] sm:$0xff] %vm547_vm1, %v5053_v3  ;;  %6784 = vmatmul.mubr.msk.bf16.gmra.mrb[56].mxu0 %vm547_vm1, %v8780_v2  ;;  %v4213_v3 = vshrl.u32 %v8824_v26, 16  ;;  %v4716_v43 = vrot.slane %v5795_v24, 3  ;;  %v4729_v50 = vrot.slane %v8606_v40, 3 }
 0x230   : > { %5087 = vst.msk [vmem:[%s8581_s30 + $0xa8] sm:$0xff] %vm547_vm1, %v5051_v36  ;;  %6787 = vmatprep.mubr.msk.bf16.mxu0 %vm547_vm1, %v8793_v33  ;;  %v4210_v36 = vor.u32 %v4209_v51, %v4206_v37 }
 0x231   : > { %v4215_v49 = vrot.slane %v4213_v3, 2 }
 0x232   : > { %v6447_v5 = vpop.f32.mrb[24].mxu0 }
 0x233   : > { %v5056_v47 = vadd.f32 %v6447_v5, %v8571_v54  ;;  %v2264_v57 = vpop.f32.mrb[25].mxu0 }
 0x234   : > { %v5054_v12 = vadd.f32 %v8571_v54, %v2264_v57  ;;  %6712 = vmatmul.mubr.msk.bf16.gmra.mrb[60].mxu1 %vm547_vm1, %v3765_v7  ;;  %v6448_v45 = vpop.f32.mrb[26].mxu0 }
 0x235   : > { %5092 = vst.msk [vmem:[%s8581_s30 + $0xd0] sm:$0xff] %vm547_vm1, %v5056_v47  ;;  %v5057_v32 = vadd.f32 %v6448_v45, %v8571_v54  ;;  %v2267_v46 = vpop.f32.mrb[27].mxu0  ;;  %6715 = vmatprep.mubr.msk.bf16.mxu1 %vm547_vm1, %v3767_v55  ;;  %v8855_v55 = vsel %vm4050_vm6, %v4192_v56, %v4201_v10  ;;  %v4218_v47 = vrot.slane %v4216_v38, 3  ;;  %v8862_v45 = vsel %vm4050_vm6, %v4201_v10, %v4210_v36 }
 0x236   : > { %5090 = vst.msk [vmem:[%s8581_s30 + $0xc0] sm:$0xff] %vm547_vm1, %v5054_v12  ;;  %v5055_v6 = vadd.f32 %v8571_v54, %v2267_v46  ;;  %v3772_v12 = vrot.slane %v7393_v21, 2  ;;  %v4717_v46 = vrot.slane %v8526_v22, 3 }
 0x237   : > { %5093 = vst.msk [vmem:[%s8581_s30 + $0xd8] sm:$0xff] %vm547_vm1, %v5057_v32  ;;  %6788 = vmatmul.mubr.msk.bf16.gmra.mrb[60].mxu0 %vm547_vm1, %v8821_v29  ;;  %v4219_v41 = vor.u32 %v4218_v47, %v4215_v49 }
 0x238   : > { %5091 = vst.msk [vmem:[%s8581_s30 + $0xc8] sm:$0xff] %vm547_vm1, %v5055_v6  ;;  %6791 = vmatprep.mubr.msk.bf16.mxu0 %vm547_vm1, %v8831_v19  ;;  %v3773_v32 = vsel %vm2935_vm5, %v3770_v59, %v3772_v12 }
 0x239   : > { %v8882_v38 = vsel %vm4050_vm6, %v4210_v36, %v4219_v41  ;;  %v4719_v36 = vrot.slane %v8536_v0, 3  ;;  %v4725_v0 = vrot.slane %v8563_v27, 3 }
 0x23a   : > { %v6451_v63 = vpop.f32.mrb[28].mxu0 }
 0x23b   : > { %v5060_v7 = vadd.f32 %v6451_v63, %v8571_v54  ;;  %v2280_v23 = vpop.f32.mrb[29].mxu0  ;;  %v4721_v63 = vrot.slane %v8540_v35, 3 }
 0x23c   : > { %v5058_v58 = vadd.f32 %v8571_v54, %v2280_v23  ;;  %6716 = vmatmul.mubr.msk.bf16.gmra.mrb[64].mxu1 %vm547_vm1, %v3769_v13  ;;  %v6452_v5 = vpop.f32.mrb[30].mxu0  ;;  %v4718_v13 = vsel %vm4715_vm7, %v4716_v43, %v4717_v46 }
 0x23d   : > { %5096 = vst.msk [vmem:[%s8581_s30 + $0xf0] sm:$0xff] %vm547_vm1, %v5060_v7  ;;  %v5061_v57 = vadd.f32 %v6452_v5, %v8571_v54  ;;  %v2283_v18 = vpop.f32.mrb[31].mxu0  ;;  %6719 = vmatprep.mubr.msk.bf16.mxu1 %vm547_vm1, %v3771_v11  ;;  %v4722_v11 = vsel %vm4715_vm7, %v4719_v36, %v4721_v63  ;;  %v4724_v35 = vsel %vm4715_vm7, %v4721_v63, %v4723_v15 }
 0x23e   : > { %5094 = vst.msk [vmem:[%s8581_s30 + $0xe0] sm:$0xff] %vm547_vm1, %v5058_v58  ;;  %v5059_v56 = vadd.f32 %v8571_v54, %v2283_v18 }
 0x23f   : > { %5097 = vst.msk [vmem:[%s8581_s30 + $0xf8] sm:$0xff] %vm547_vm1, %v5061_v57  ;;  %6792 = vmatmul.mubr.msk.bf16.gmra.mrb[64].mxu0 %vm547_vm1, %v8855_v55 }
 0x240   : > { %5095 = vst.msk [vmem:[%s8581_s30 + $0xe8] sm:$0xff] %vm547_vm1, %v5059_v56  ;;  %6795 = vmatprep.mubr.msk.bf16.mxu0 %vm547_vm1, %v8862_v45 }
 0x242   : > { %v6455_v37 = vpop.f32.mrb[32].mxu0 }
 0x243   : > { %v5064_v51 = vadd.f32 %v6455_v37, %v8571_v54  ;;  %v2296_v6 = vpop.f32.mrb[33].mxu0 }
 0x244   : > { %v5062_v10 = vadd.f32 %v8571_v54, %v2296_v6  ;;  %6720 = vmatmul.mubr.msk.bf16.gmra.mrb[68].mxu1 %vm547_vm1, %v3773_v32  ;;  %v6456_v3 = vpop.f32.mrb[34].mxu0 }
 0x245   : > { %5100 = vst.msk [vmem:[%s8581_s30 + $0x110] sm:$0xff] %vm547_vm1, %v5064_v51  ;;  %v5065_v59 = vadd.f32 %v6456_v3, %v8571_v54  ;;  %v2299_v22 = vpop.f32.mrb[35].mxu0  ;;  %6725 = vmatprep.mubr.msk.bf16.mxu1 %vm547_vm1, %v8560_v62  ;;  %v4720_v62 = vsel %vm4715_vm7, %v4717_v46, %v4719_v36 }
 0x246   : > { %5098 = vst.msk [vmem:[%s8581_s30 + $0x100] sm:$0xff] %vm547_vm1, %v5062_v10  ;;  %v5063_v21 = vadd.f32 %v8571_v54, %v2299_v22 }
 0x247   : > { %5101 = vst.msk [vmem:[%s8581_s30 + $0x118] sm:$0xff] %vm547_vm1, %v5065_v59  ;;  %6796 = vmatmul.mubr.msk.bf16.gmra.mrb[68].mxu0 %vm547_vm1, %v8882_v38 }
 0x248   : > { %5099 = vst.msk [vmem:[%s8581_s30 + $0x108] sm:$0xff] %vm547_vm1, %v5063_v21  ;;  %6801 = vmatprep.mubr.msk.bf16.mxu0 %vm547_vm1, %v4718_v13 }
 0x24c   : > { %6726 = vmatmul.mubr.msk.bf16.vlgmr.msra.gmra.mrb[36].mxu1 %vm547_vm1, %v8590_v61  ;;  %v4726_v61 = vsel %vm4715_vm7, %v4723_v15, %v4725_v0 }
 0x24d   : > { %6729 = vmatprep.mubr.msk.bf16.mxu1 %vm547_vm1, %v8603_v25  ;;  %v4727_v25 = vrot.slane %v8596_v31, 3  ;;  %v4733_v31 = vrot.slane %v8644_v1, 3 }
 0x24f   : > { %6802 = vmatmul.mubr.msk.bf16.vlgmr.msra.gmra.mrb[36].mxu0 %vm547_vm1, %v4720_v62  ;;  %v4728_v27 = vsel %vm4715_vm7, %v4725_v0, %v4727_v25 }
 0x250   : > { %6805 = vmatprep.mubr.msk.bf16.mxu0 %vm547_vm1, %v4722_v11 }
 0x254   : > { %6730 = vmatmul.mubr.msk.bf16.gmra.mrb[40].mxu1 %vm547_vm1, %v8628_v52  ;;  %v4730_v52 = vsel %vm4715_vm7, %v4727_v25, %v4729_v50 }
 0x255   : > { %6733 = vmatprep.mubr.msk.bf16.mxu1 %vm547_vm1, %v8641_v28  ;;  %v4731_v28 = vrot.slane %v8631_v16, 3  ;;  %v4737_v16 = vrot.slane %v8682_v17, 3 }
 0x257   : > { %6806 = vmatmul.mubr.msk.bf16.gmra.mrb[40].mxu0 %vm547_vm1, %v4724_v35  ;;  %v4732_v40 = vsel %vm4715_vm7, %v4729_v50, %v4731_v28 }
 0x258   : > { %6809 = vmatprep.mubr.msk.bf16.mxu0 %vm547_vm1, %v4726_v61 }
 0x25c   : > { %6734 = vmatmul.mubr.msk.bf16.gmra.mrb[44].mxu1 %vm547_vm1, %v8668_v14  ;;  %v4734_v14 = vsel %vm4715_vm7, %v4731_v28, %v4733_v31 }
 0x25d   : > { %6737 = vmatprep.mubr.msk.bf16.mxu1 %vm547_vm1, %v8679_v48  ;;  %v4735_v48 = vrot.slane %v8672_v30, 3  ;;  %v4741_v30 = vrot.slane %v8720_v53, 3 }
 0x25f   : > { %6810 = vmatmul.mubr.msk.bf16.gmra.mrb[44].mxu0 %vm547_vm1, %v4728_v27  ;;  %v4736_v1 = vsel %vm4715_vm7, %v4733_v31, %v4735_v48 }
 0x260   : > { %6813 = vmatprep.mubr.msk.bf16.mxu0 %vm547_vm1, %v4730_v52 }
 0x264   : > { %6738 = vmatmul.mubr.msk.bf16.gmra.mrb[48].mxu1 %vm547_vm1, %v8704_v39  ;;  %v4738_v39 = vsel %vm4715_vm7, %v4735_v48, %v4737_v16 }
 0x265   : > { %6741 = vmatprep.mubr.msk.bf16.mxu1 %vm547_vm1, %v8717_v8  ;;  %v4739_v8 = vrot.slane %v8707_v42, 3  ;;  %v4745_v42 = vrot.slane %v8758_v20, 3 }
 0x267   : > { %6814 = vmatmul.mubr.msk.bf16.gmra.mrb[48].mxu0 %vm547_vm1, %v4732_v40  ;;  %v4740_v17 = vsel %vm4715_vm7, %v4737_v16, %v4739_v8 }
 0x268   : > { %6817 = vmatprep.mubr.msk.bf16.mxu0 %vm547_vm1, %v4734_v14 }
 0x26c   : > { %6742 = vmatmul.mubr.msk.bf16.gmra.mrb[52].mxu1 %vm547_vm1, %v8744_v60  ;;  %v4742_v60 = vsel %vm4715_vm7, %v4739_v8, %v4741_v30 }
 0x26d   : > { %6745 = vmatprep.mubr.msk.bf16.mxu1 %vm547_vm1, %v8755_v44  ;;  %v4743_v44 = vrot.slane %v8748_v9, 3  ;;  %v4749_v9 = vrot.slane %v8796_v4, 3 }
 0x26f   : > { %6818 = vmatmul.mubr.msk.bf16.gmra.mrb[52].mxu0 %vm547_vm1, %v4736_v1  ;;  %v4744_v53 = vsel %vm4715_vm7, %v4741_v30, %v4743_v44 }
 0x270   : > { %6821 = vmatprep.mubr.msk.bf16.mxu0 %vm547_vm1, %v4738_v39 }
 0x274   : > { %6746 = vmatmul.mubr.msk.bf16.gmra.mrb[56].mxu1 %vm547_vm1, %v8780_v2  ;;  %v4746_v2 = vsel %vm4715_vm7, %v4743_v44, %v4745_v42 }
 0x275   : > { %6749 = vmatprep.mubr.msk.bf16.mxu1 %vm547_vm1, %v8793_v33  ;;  %v4747_v33 = vrot.slane %v8786_v34, 3  ;;  %v4751_v34 = vrot.slane %v8824_v26, 3 }
 0x277   : > { %6822 = vmatmul.mubr.msk.bf16.gmra.mrb[56].mxu0 %vm547_vm1, %v4740_v17  ;;  %v4748_v20 = vsel %vm4715_vm7, %v4745_v42, %v4747_v33  ;;  %v4752_v4 = vsel %vm4715_vm7, %v4749_v9, %v4751_v34 }
 0x278   : > { %6825 = vmatprep.mubr.msk.bf16.mxu0 %vm547_vm1, %v4742_v60 }
 0x27c   : > { %6750 = vmatmul.mubr.msk.bf16.gmra.mrb[60].mxu1 %vm547_vm1, %v8821_v29  ;;  %v4750_v29 = vsel %vm4715_vm7, %v4747_v33, %v4749_v9 }
 0x27d   : > { %6753 = vmatprep.mubr.msk.bf16.mxu1 %vm547_vm1, %v8831_v19 }
 0x27f   : > { %6826 = vmatmul.mubr.msk.bf16.gmra.mrb[60].mxu0 %vm547_vm1, %v4744_v53 }
 0x280   : > { %6829 = vmatprep.mubr.msk.bf16.mxu0 %vm547_vm1, %v4746_v2 }
 0x284   : > { %6754 = vmatmul.mubr.msk.bf16.gmra.mrb[64].mxu1 %vm547_vm1, %v8855_v55 }
 0x285   : > { %6757 = vmatprep.mubr.msk.bf16.mxu1 %vm547_vm1, %v8862_v45 }
 0x287   : > { %6830 = vmatmul.mubr.msk.bf16.gmra.mrb[64].mxu0 %vm547_vm1, %v4748_v20 }
 0x288   : > { %6833 = vmatprep.mubr.msk.bf16.mxu0 %vm547_vm1, %v4750_v29 }
 0x28c   : > { %6758 = vmatmul.mubr.msk.bf16.gmra.mrb[68].mxu1 %vm547_vm1, %v8882_v38 }
 0x28f   : > { %v6575_v19 = vpop.f32.mrb[0].mxu1  ;;  %6834 = vmatmul.mubr.msk.bf16.gmra.mrb[68].mxu0 %vm547_vm1, %v4752_v4 }
 0x290   : > { %v5104_v7 = vadd.f32 %v6575_v19, %v8571_v54  ;;  %v3064_v23 = vpop.f32.mrb[1].mxu1 }
 0x291   : > { %v5102_v58 = vadd.f32 %v8571_v54, %v3064_v23  ;;  %v6576_v5 = vpop.f32.mrb[2].mxu1 }
 0x292   : > { %5817 = vst.msk [vmem:[%s8581_s30 + $0x130] sm:$0xff] %vm547_vm1, %v5104_v7  ;;  %v5105_v26 = vadd.f32 %v6576_v5, %v8571_v54  ;;  %v3067_v55 = vpop.f32.mrb[3].mxu1 }
 0x293   : > { %5815 = vst.msk [vmem:[%s8581_s30 + $0x120] sm:$0xff] %vm547_vm1, %v5102_v58  ;;  %v5103_v49 = vadd.f32 %v8571_v54, %v3067_v55 }
 0x294   : > { %5818 = vst.msk [vmem:[%s8581_s30 + $0x138] sm:$0xff] %vm547_vm1, %v5105_v26 }
 0x295   : > { %5816 = vst.msk [vmem:[%s8581_s30 + $0x128] sm:$0xff] %vm547_vm1, %v5103_v49 }
 0x297   : > { %v6579_v47 = vpop.f32.mrb[4].mxu1 }
 0x298   : > { %v5108_v57 = vadd.f32 %v6579_v47, %v8571_v54  ;;  %v3080_v18 = vpop.f32.mrb[5].mxu1 }
 0x299   : > { %v5106_v12 = vadd.f32 %v8571_v54, %v3080_v18  ;;  %v6580_v45 = vpop.f32.mrb[6].mxu1 }
 0x29a   : > { %5821 = vst.msk [vmem:[%s8581_s30 + $0x150] sm:$0xff] %vm547_vm1, %v5108_v57  ;;  %v5109_v24 = vadd.f32 %v6580_v45, %v8571_v54  ;;  %v3083_v56 = vpop.f32.mrb[7].mxu1 }
 0x29b   : > { %5819 = vst.msk [vmem:[%s8581_s30 + $0x140] sm:$0xff] %vm547_vm1, %v5106_v12  ;;  %v5107_v41 = vadd.f32 %v8571_v54, %v3083_v56 }
 0x29c   : > { %5822 = vst.msk [vmem:[%s8581_s30 + $0x158] sm:$0xff] %vm547_vm1, %v5109_v24 }
 0x29d   : > { %5820 = vst.msk [vmem:[%s8581_s30 + $0x148] sm:$0xff] %vm547_vm1, %v5107_v41 }
 0x29f   : > { %v6583_v32 = vpop.f32.mrb[8].mxu1 }
 0x2a0   : > { %v5112_v43 = vadd.f32 %v6583_v32, %v8571_v54  ;;  %v3096_v46 = vpop.f32.mrb[9].mxu1 }
 0x2a1   : > { %v5110_v37 = vadd.f32 %v8571_v54, %v3096_v46  ;;  %v6584_v51 = vpop.f32.mrb[10].mxu1 }
 0x2a2   : > { %5825 = vst.msk [vmem:[%s8581_s30 + $0x170] sm:$0xff] %vm547_vm1, %v5112_v43  ;;  %v5113_v6 = vadd.f32 %v6584_v51, %v8571_v54  ;;  %v3099_v10 = vpop.f32.mrb[11].mxu1 }
 0x2a3   : > { %5823 = vst.msk [vmem:[%s8581_s30 + $0x160] sm:$0xff] %vm547_vm1, %v5110_v37  ;;  %v5111_v3 = vadd.f32 %v8571_v54, %v3099_v10 }
 0x2a4   : > { %5826 = vst.msk [vmem:[%s8581_s30 + $0x178] sm:$0xff] %vm547_vm1, %v5113_v6 }
 0x2a5   : > { %5824 = vst.msk [vmem:[%s8581_s30 + $0x168] sm:$0xff] %vm547_vm1, %v5111_v3 }
 0x2a7   : > { %v6587_v38 = vpop.f32.mrb[12].mxu1 }
 0x2a8   : > { %v5116_v59 = vadd.f32 %v6587_v38, %v8571_v54  ;;  %v3112_v22 = vpop.f32.mrb[13].mxu1 }
 0x2a9   : > { %v5114_v13 = vadd.f32 %v8571_v54, %v3112_v22  ;;  %v6588_v21 = vpop.f32.mrb[14].mxu1 }
 0x2aa   : > { %5829 = vst.msk [vmem:[%s8581_s30 + $0x190] sm:$0xff] %vm547_vm1, %v5116_v59  ;;  %v5117_v36 = vadd.f32 %v6588_v21, %v8571_v54  ;;  %v3115_v63 = vpop.f32.mrb[15].mxu1 }
 0x2ab   : > { %5827 = vst.msk [vmem:[%s8581_s30 + $0x180] sm:$0xff] %vm547_vm1, %v5114_v13  ;;  %v5115_v62 = vadd.f32 %v8571_v54, %v3115_v63 }
 0x2ac   : > { %5830 = vst.msk [vmem:[%s8581_s30 + $0x198] sm:$0xff] %vm547_vm1, %v5117_v36 }
 0x2ad   : > { %5828 = vst.msk [vmem:[%s8581_s30 + $0x188] sm:$0xff] %vm547_vm1, %v5115_v62 }
 0x2af   : > { %v6591_v11 = vpop.f32.mrb[16].mxu1 }
 0x2b0   : > { %v5120_v15 = vadd.f32 %v6591_v11, %v8571_v54  ;;  %v3128_v0 = vpop.f32.mrb[17].mxu1 }
 0x2b1   : > { %v5118_v35 = vadd.f32 %v8571_v54, %v3128_v0  ;;  %v6592_v61 = vpop.f32.mrb[18].mxu1 }
 0x2b2   : > { %5833 = vst.msk [vmem:[%s8581_s30 + $0x1b0] sm:$0xff] %vm547_vm1, %v5120_v15  ;;  %v5121_v25 = vadd.f32 %v6592_v61, %v8571_v54  ;;  %v3131_v50 = vpop.f32.mrb[19].mxu1 }
 0x2b3   : > { %5831 = vst.msk [vmem:[%s8581_s30 + $0x1a0] sm:$0xff] %vm547_vm1, %v5118_v35  ;;  %v5119_v27 = vadd.f32 %v8571_v54, %v3131_v50  ;;  %v9133_v50 = vld [vmem:[#allocation4] ss:$0 sm:$0xff] }
 0x2b4   : > { %5834 = vst.msk [vmem:[%s8581_s30 + $0x1b8] sm:$0xff] %vm547_vm1, %v5121_v25 }
 0x2b5   : > { %5832 = vst.msk [vmem:[%s8581_s30 + $0x1a8] sm:$0xff] %vm547_vm1, %v5119_v27 }
 0x2b7   : > { %v6595_v52 = vpop.f32.mrb[20].mxu1 }
 0x2b8   : > { %v5124_v28 = vadd.f32 %v6595_v52, %v8571_v54  ;;  %v3144_v31 = vpop.f32.mrb[21].mxu1 }
 0x2b9   : > { %v5122_v40 = vadd.f32 %v8571_v54, %v3144_v31  ;;  %v6596_v14 = vpop.f32.mrb[22].mxu1 }
 0x2ba   : > { %5837 = vst.msk [vmem:[%s8581_s30 + $0x1d0] sm:$0xff] %vm547_vm1, %v5124_v28  ;;  %v5125_v48 = vadd.f32 %v6596_v14, %v8571_v54  ;;  %v3147_v16 = vpop.f32.mrb[23].mxu1 }
 0x2bb   : > { %5835 = vst.msk [vmem:[%s8581_s30 + $0x1c0] sm:$0xff] %vm547_vm1, %v5122_v40  ;;  %v5123_v1 = vadd.f32 %v8571_v54, %v3147_v16 }
 0x2bc   : > { %5838 = vst.msk [vmem:[%s8581_s30 + $0x1d8] sm:$0xff] %vm547_vm1, %v5125_v48 }
 0x2bd   : > { %5836 = vst.msk [vmem:[%s8581_s30 + $0x1c8] sm:$0xff] %vm547_vm1, %v5123_v1 }
 0x2bf   : > { %v6599_v39 = vpop.f32.mrb[24].mxu1 }
 0x2c0   : > { %v5128_v8 = vadd.f32 %v6599_v39, %v8571_v54  ;;  %v3160_v30 = vpop.f32.mrb[25].mxu1 }
 0x2c1   : > { %v5126_v17 = vadd.f32 %v8571_v54, %v3160_v30  ;;  %v6600_v60 = vpop.f32.mrb[26].mxu1 }
 0x2c2   : > { %5841 = vst.msk [vmem:[%s8581_s30 + $0x1f0] sm:$0xff] %vm547_vm1, %v5128_v8  ;;  %v5129_v44 = vadd.f32 %v6600_v60, %v8571_v54  ;;  %v3163_v42 = vpop.f32.mrb[27].mxu1 }
 0x2c3   : > { %5839 = vst.msk [vmem:[%s8581_s30 + $0x1e0] sm:$0xff] %vm547_vm1, %v5126_v17  ;;  %v5127_v53 = vadd.f32 %v8571_v54, %v3163_v42 }
 0x2c4   : > { %5842 = vst.msk [vmem:[%s8581_s30 + $0x1f8] sm:$0xff] %vm547_vm1, %v5129_v44 }
 0x2c5   : > { %5840 = vst.msk [vmem:[%s8581_s30 + $0x1e8] sm:$0xff] %vm547_vm1, %v5127_v53 }
 0x2c7   : > { %v6603_v2 = vpop.f32.mrb[28].mxu1 }
 0x2c8   : > { %v5132_v33 = vadd.f32 %v6603_v2, %v8571_v54  ;;  %v3176_v9 = vpop.f32.mrb[29].mxu1 }
 0x2c9   : > { %v5130_v20 = vadd.f32 %v8571_v54, %v3176_v9  ;;  %v6604_v29 = vpop.f32.mrb[30].mxu1 }
 0x2ca   : > { %5845 = vst.msk [vmem:[%s8581_s30 + $0x210] sm:$0xff] %vm547_vm1, %v5132_v33  ;;  %v5133_v34 = vadd.f32 %v6604_v29, %v8571_v54  ;;  %v3179_v4 = vpop.f32.mrb[31].mxu1 }
 0x2cb   : > { %5843 = vst.msk [vmem:[%s8581_s30 + $0x200] sm:$0xff] %vm547_vm1, %v5130_v20  ;;  %v5131_v19 = vadd.f32 %v8571_v54, %v3179_v4 }
 0x2cc   : > { %5846 = vst.msk [vmem:[%s8581_s30 + $0x218] sm:$0xff] %vm547_vm1, %v5133_v34 }
 0x2cd   : > { %5844 = vst.msk [vmem:[%s8581_s30 + $0x208] sm:$0xff] %vm547_vm1, %v5131_v19 }
 0x2cf   : > { %v6607_v7 = vpop.f32.mrb[32].mxu1 }
 0x2d0   : > { %v5136_v23 = vadd.f32 %v6607_v7, %v8571_v54  ;;  %v3192_v58 = vpop.f32.mrb[33].mxu1 }
 0x2d1   : > { %v5134_v5 = vadd.f32 %v8571_v54, %v3192_v58  ;;  %v6608_v26 = vpop.f32.mrb[34].mxu1 }
 0x2d2   : > { %5849 = vst.msk [vmem:[%s8581_s30 + $0x230] sm:$0xff] %vm547_vm1, %v5136_v23  ;;  %v5137_v55 = vadd.f32 %v6608_v26, %v8571_v54  ;;  %v3195_v49 = vpop.f32.mrb[35].mxu1 }
 0x2d3   : > { %5847 = vst.msk [vmem:[%s8581_s30 + $0x220] sm:$0xff] %vm547_vm1, %v5134_v5  ;;  %v5135_v47 = vadd.f32 %v8571_v54, %v3195_v49 }
 0x2d4   : > { %5850 = vst.msk [vmem:[%s8581_s30 + $0x238] sm:$0xff] %vm547_vm1, %v5137_v55 }
 0x2d5   : > { %5848 = vst.msk [vmem:[%s8581_s30 + $0x228] sm:$0xff] %vm547_vm1, %v5135_v47 }
 0x31f   : > { %v6727_v57 = vpop.f32.mrb[36].mxu1 }
 0x320   : > { %v5177_v18 = vadd.f32 %v6727_v57, %v8571_v54  ;;  %v4312_v12 = vpop.f32.mrb[37].mxu1 }
 0x321   : > { %v5175_v45 = vadd.f32 %v8571_v54, %v4312_v12  ;;  %v6728_v24 = vpop.f32.mrb[38].mxu1 }
 0x322   : > { %5853 = vst.msk [vmem:[%s8581_s30 + $0x250] sm:$0xff] %vm547_vm1, %v5177_v18  ;;  %v5178_v56 = vadd.f32 %v6728_v24, %v8571_v54  ;;  %v4315_v41 = vpop.f32.mrb[39].mxu1  ;;  %v6803_v32 = vpop.f32.mrb[36].mxu0 }
 0x323   : > { %5851 = vst.msk [vmem:[%s8581_s30 + $0x240] sm:$0xff] %vm547_vm1, %v5175_v45  ;;  %v5176_v43 = vadd.f32 %v8571_v54, %v4315_v41  ;;  %v5250_v46 = vadd.f32 %v6803_v32, %v8571_v54  ;;  %v4844_v37 = vpop.f32.mrb[37].mxu0 }
 0x324   : > { %5854 = vst.msk [vmem:[%s8581_s30 + $0x258] sm:$0xff] %vm547_vm1, %v5178_v56  ;;  %v5248_v51 = vadd.f32 %v8571_v54, %v4844_v37  ;;  %v6804_v6 = vpop.f32.mrb[38].mxu0 }
 0x325   : > { %5852 = vst.msk [vmem:[%s8581_s30 + $0x248] sm:$0xff] %vm547_vm1, %v5176_v43  ;;  %5889 = vst.msk [vmem:[%s8581_s30 + $0x370] sm:$0xff] %vm547_vm1, %v5250_v46  ;;  %v5251_v10 = vadd.f32 %v6804_v6, %v8571_v54  ;;  %v4847_v3 = vpop.f32.mrb[39].mxu0 }
 0x326   : > { %5887 = vst.msk [vmem:[%s8581_s30 + $0x360] sm:$0xff] %vm547_vm1, %v5248_v51  ;;  %v5249_v38 = vadd.f32 %v8571_v54, %v4847_v3 }
 0x327   : > { %5890 = vst.msk [vmem:[%s8581_s30 + $0x378] sm:$0xff] %vm547_vm1, %v5251_v10  ;;  %v6731_v59 = vpop.f32.mrb[40].mxu1 }
 0x328   : > { %5888 = vst.msk [vmem:[%s8581_s30 + $0x368] sm:$0xff] %vm547_vm1, %v5249_v38  ;;  %v5181_v22 = vadd.f32 %v6731_v59, %v8571_v54  ;;  %v4328_v13 = vpop.f32.mrb[41].mxu1 }
 0x329   : > { %v5179_v21 = vadd.f32 %v8571_v54, %v4328_v13  ;;  %v6732_v36 = vpop.f32.mrb[42].mxu1 }
 0x32a   : > { %5857 = vst.msk [vmem:[%s8581_s30 + $0x270] sm:$0xff] %vm547_vm1, %v5181_v22  ;;  %v5182_v63 = vadd.f32 %v6732_v36, %v8571_v54  ;;  %v4331_v62 = vpop.f32.mrb[43].mxu1  ;;  %v6807_v11 = vpop.f32.mrb[40].mxu0 }
 0x32b   : > { %5855 = vst.msk [vmem:[%s8581_s30 + $0x260] sm:$0xff] %vm547_vm1, %v5179_v21  ;;  %v5180_v15 = vadd.f32 %v8571_v54, %v4331_v62  ;;  %v5254_v0 = vadd.f32 %v6807_v11, %v8571_v54  ;;  %v4860_v35 = vpop.f32.mrb[41].mxu0 }
 0x32c   : > { %5858 = vst.msk [vmem:[%s8581_s30 + $0x278] sm:$0xff] %vm547_vm1, %v5182_v63  ;;  %v5252_v61 = vadd.f32 %v8571_v54, %v4860_v35  ;;  %v6808_v25 = vpop.f32.mrb[42].mxu0 }
 0x32d   : > { %5856 = vst.msk [vmem:[%s8581_s30 + $0x268] sm:$0xff] %vm547_vm1, %v5180_v15  ;;  %5893 = vst.msk [vmem:[%s8581_s30 + $0x390] sm:$0xff] %vm547_vm1, %v5254_v0  ;;  %v5255_v27 = vadd.f32 %v9133_v50, %v6808_v25  ;;  %v4863_v52 = vpop.f32.mrb[43].mxu0 }
 0x32e   : > { %5891 = vst.msk [vmem:[%s8581_s30 + $0x380] sm:$0xff] %vm547_vm1, %v5252_v61  ;;  %v5253_v28 = vadd.f32 %v9133_v50, %v4863_v52 }
 0x32f   : > { %5894 = vst.msk [vmem:[%s8581_s30 + $0x398] sm:$0xff] %vm547_vm1, %v5255_v27  ;;  %v6735_v54 = vpop.f32.mrb[44].mxu1 }
 0x330   : > { %5892 = vst.msk [vmem:[%s8581_s30 + $0x388] sm:$0xff] %vm547_vm1, %v5253_v28  ;;  %v5185_v31 = vadd.f32 %v9133_v50, %v6735_v54  ;;  %v4344_v40 = vpop.f32.mrb[45].mxu1 }
 0x331   : > { %v5183_v14 = vadd.f32 %v9133_v50, %v4344_v40  ;;  %v6736_v48 = vpop.f32.mrb[46].mxu1 }
 0x332   : > { %5861 = vst.msk [vmem:[%s8581_s30 + $0x290] sm:$0xff] %vm547_vm1, %v5185_v31  ;;  %v5186_v16 = vadd.f32 %v9133_v50, %v6736_v48  ;;  %v4347_v1 = vpop.f32.mrb[47].mxu1  ;;  %v6811_v39 = vpop.f32.mrb[44].mxu0 }
 0x333   : > { %5859 = vst.msk [vmem:[%s8581_s30 + $0x280] sm:$0xff] %vm547_vm1, %v5183_v14  ;;  %v5184_v8 = vadd.f32 %v9133_v50, %v4347_v1  ;;  %v5258_v30 = vadd.f32 %v9133_v50, %v6811_v39  ;;  %v4876_v17 = vpop.f32.mrb[45].mxu0 }
 0x334   : > { %5862 = vst.msk [vmem:[%s8581_s30 + $0x298] sm:$0xff] %vm547_vm1, %v5186_v16  ;;  %v5256_v60 = vadd.f32 %v9133_v50, %v4876_v17  ;;  %v6812_v44 = vpop.f32.mrb[46].mxu0 }
 0x335   : > { %5860 = vst.msk [vmem:[%s8581_s30 + $0x288] sm:$0xff] %vm547_vm1, %v5184_v8  ;;  %5897 = vst.msk [vmem:[%s8581_s30 + $0x3b0] sm:$0xff] %vm547_vm1, %v5258_v30  ;;  %v5259_v42 = vadd.f32 %v9133_v50, %v6812_v44  ;;  %v4879_v53 = vpop.f32.mrb[47].mxu0 }
 0x336   : > { %5895 = vst.msk [vmem:[%s8581_s30 + $0x3a0] sm:$0xff] %vm547_vm1, %v5256_v60  ;;  %v5257_v2 = vadd.f32 %v9133_v50, %v4879_v53 }
 0x337   : > { %5898 = vst.msk [vmem:[%s8581_s30 + $0x3b8] sm:$0xff] %vm547_vm1, %v5259_v42  ;;  %v6739_v33 = vpop.f32.mrb[48].mxu1 }
 0x338   : > { %5896 = vst.msk [vmem:[%s8581_s30 + $0x3a8] sm:$0xff] %vm547_vm1, %v5257_v2  ;;  %v5189_v9 = vadd.f32 %v9133_v50, %v6739_v33  ;;  %v4360_v20 = vpop.f32.mrb[49].mxu1 }
 0x339   : > { %v5187_v29 = vadd.f32 %v9133_v50, %v4360_v20  ;;  %v6740_v34 = vpop.f32.mrb[50].mxu1 }
 0x33a   : > { %5865 = vst.msk [vmem:[%s8581_s30 + $0x2b0] sm:$0xff] %vm547_vm1, %v5189_v9  ;;  %v5190_v4 = vadd.f32 %v9133_v50, %v6740_v34  ;;  %v4363_v19 = vpop.f32.mrb[51].mxu1  ;;  %v6815_v7 = vpop.f32.mrb[48].mxu0 }
 0x33b   : > { %5863 = vst.msk [vmem:[%s8581_s30 + $0x2a0] sm:$0xff] %vm547_vm1, %v5187_v29  ;;  %v5188_v23 = vadd.f32 %v9133_v50, %v4363_v19  ;;  %v5262_v58 = vadd.f32 %v9133_v50, %v6815_v7  ;;  %v4892_v5 = vpop.f32.mrb[49].mxu0 }
 0x33c   : > { %5866 = vst.msk [vmem:[%s8581_s30 + $0x2b8] sm:$0xff] %vm547_vm1, %v5190_v4  ;;  %v5260_v26 = vadd.f32 %v9133_v50, %v4892_v5  ;;  %v6816_v55 = vpop.f32.mrb[50].mxu0 }
 0x33d   : > { %5864 = vst.msk [vmem:[%s8581_s30 + $0x2a8] sm:$0xff] %vm547_vm1, %v5188_v23  ;;  %5901 = vst.msk [vmem:[%s8581_s30 + $0x3d0] sm:$0xff] %vm547_vm1, %v5262_v58  ;;  %v5263_v49 = vadd.f32 %v9133_v50, %v6816_v55  ;;  %v4895_v47 = vpop.f32.mrb[51].mxu0 }
 0x33e   : > { %5899 = vst.msk [vmem:[%s8581_s30 + $0x3c0] sm:$0xff] %vm547_vm1, %v5260_v26  ;;  %v5261_v57 = vadd.f32 %v9133_v50, %v4895_v47 }
 0x33f   : > { %5902 = vst.msk [vmem:[%s8581_s30 + $0x3d8] sm:$0xff] %vm547_vm1, %v5263_v49  ;;  %v6743_v18 = vpop.f32.mrb[52].mxu1 }
 0x340   : > { %5900 = vst.msk [vmem:[%s8581_s30 + $0x3c8] sm:$0xff] %vm547_vm1, %v5261_v57  ;;  %v5193_v12 = vadd.f32 %v9133_v50, %v6743_v18  ;;  %v4376_v45 = vpop.f32.mrb[53].mxu1 }
 0x341   : > { %v5191_v24 = vadd.f32 %v9133_v50, %v4376_v45  ;;  %v6744_v56 = vpop.f32.mrb[54].mxu1 }
 0x342   : > { %5869 = vst.msk [vmem:[%s8581_s30 + $0x2d0] sm:$0xff] %vm547_vm1, %v5193_v12  ;;  %v5194_v41 = vadd.f32 %v9133_v50, %v6744_v56  ;;  %v4379_v32 = vpop.f32.mrb[55].mxu1  ;;  %v6819_v43 = vpop.f32.mrb[52].mxu0 }
 0x343   : > { %5867 = vst.msk [vmem:[%s8581_s30 + $0x2c0] sm:$0xff] %vm547_vm1, %v5191_v24  ;;  %v5192_v46 = vadd.f32 %v9133_v50, %v4379_v32  ;;  %v5266_v37 = vadd.f32 %v9133_v50, %v6819_v43  ;;  %v4908_v51 = vpop.f32.mrb[53].mxu0 }
 0x344   : > { %5870 = vst.msk [vmem:[%s8581_s30 + $0x2d8] sm:$0xff] %vm547_vm1, %v5194_v41  ;;  %v5264_v6 = vadd.f32 %v9133_v50, %v4908_v51  ;;  %v6820_v10 = vpop.f32.mrb[54].mxu0 }
 0x345   : > { %5868 = vst.msk [vmem:[%s8581_s30 + $0x2c8] sm:$0xff] %vm547_vm1, %v5192_v46  ;;  %5905 = vst.msk [vmem:[%s8581_s30 + $0x3f0] sm:$0xff] %vm547_vm1, %v5266_v37  ;;  %v5267_v3 = vadd.f32 %v9133_v50, %v6820_v10  ;;  %v4911_v38 = vpop.f32.mrb[55].mxu0 }
 0x346   : > { %5903 = vst.msk [vmem:[%s8581_s30 + $0x3e0] sm:$0xff] %vm547_vm1, %v5264_v6  ;;  %v5265_v59 = vadd.f32 %v9133_v50, %v4911_v38 }
 0x347   : > { %5906 = vst.msk [vmem:[%s8581_s30 + $0x3f8] sm:$0xff] %vm547_vm1, %v5267_v3  ;;  %v6747_v22 = vpop.f32.mrb[56].mxu1 }
 0x348   : > { %5904 = vst.msk [vmem:[%s8581_s30 + $0x3e8] sm:$0xff] %vm547_vm1, %v5265_v59  ;;  %v5197_v13 = vadd.f32 %v9133_v50, %v6747_v22  ;;  %v4392_v21 = vpop.f32.mrb[57].mxu1 }
 0x349   : > { %v5195_v36 = vadd.f32 %v9133_v50, %v4392_v21  ;;  %v6748_v63 = vpop.f32.mrb[58].mxu1 }
 0x34a   : > { %5873 = vst.msk [vmem:[%s8581_s30 + $0x2f0] sm:$0xff] %vm547_vm1, %v5197_v13  ;;  %v5198_v62 = vadd.f32 %v9133_v50, %v6748_v63  ;;  %v4395_v11 = vpop.f32.mrb[59].mxu1  ;;  %v6823_v15 = vpop.f32.mrb[56].mxu0 }
 0x34b   : > { %5871 = vst.msk [vmem:[%s8581_s30 + $0x2e0] sm:$0xff] %vm547_vm1, %v5195_v36  ;;  %v5196_v0 = vadd.f32 %v9133_v50, %v4395_v11  ;;  %v5270_v35 = vadd.f32 %v9133_v50, %v6823_v15  ;;  %v4924_v61 = vpop.f32.mrb[57].mxu0 }
 0x34c   : > { %5874 = vst.msk [vmem:[%s8581_s30 + $0x2f8] sm:$0xff] %vm547_vm1, %v5198_v62  ;;  %v5268_v25 = vadd.f32 %v9133_v50, %v4924_v61  ;;  %v6824_v27 = vpop.f32.mrb[58].mxu0 }
 0x34d   : > { %5872 = vst.msk [vmem:[%s8581_s30 + $0x2e8] sm:$0xff] %vm547_vm1, %v5196_v0  ;;  %5909 = vst.msk [vmem:[%s8581_s30 + $0x410] sm:$0xff] %vm547_vm1, %v5270_v35  ;;  %v5271_v52 = vadd.f32 %v9133_v50, %v6824_v27  ;;  %v4927_v28 = vpop.f32.mrb[59].mxu0 }
 0x34e   : > { %5907 = vst.msk [vmem:[%s8581_s30 + $0x400] sm:$0xff] %vm547_vm1, %v5268_v25  ;;  %v5269_v54 = vadd.f32 %v9133_v50, %v4927_v28 }
 0x34f   : > { %5910 = vst.msk [vmem:[%s8581_s30 + $0x418] sm:$0xff] %vm547_vm1, %v5271_v52  ;;  %v6751_v31 = vpop.f32.mrb[60].mxu1 }
 0x350   : > { %5908 = vst.msk [vmem:[%s8581_s30 + $0x408] sm:$0xff] %vm547_vm1, %v5269_v54  ;;  %v5201_v40 = vadd.f32 %v9133_v50, %v6751_v31  ;;  %v4408_v14 = vpop.f32.mrb[61].mxu1 }
 0x351   : > { %v5199_v48 = vadd.f32 %v9133_v50, %v4408_v14  ;;  %v6752_v16 = vpop.f32.mrb[62].mxu1 }
 0x352   : > { %5877 = vst.msk [vmem:[%s8581_s30 + $0x310] sm:$0xff] %vm547_vm1, %v5201_v40  ;;  %v5202_v1 = vadd.f32 %v9133_v50, %v6752_v16  ;;  %v4411_v39 = vpop.f32.mrb[63].mxu1  ;;  %v6827_v8 = vpop.f32.mrb[60].mxu0 }
 0x353   : > { %5875 = vst.msk [vmem:[%s8581_s30 + $0x300] sm:$0xff] %vm547_vm1, %v5199_v48  ;;  %v5200_v30 = vadd.f32 %v9133_v50, %v4411_v39  ;;  %v5274_v17 = vadd.f32 %v9133_v50, %v6827_v8  ;;  %v4940_v60 = vpop.f32.mrb[61].mxu0 }
 0x354   : > { %5878 = vst.msk [vmem:[%s8581_s30 + $0x318] sm:$0xff] %vm547_vm1, %v5202_v1  ;;  %v5272_v44 = vadd.f32 %v9133_v50, %v4940_v60  ;;  %v6828_v42 = vpop.f32.mrb[62].mxu0 }
 0x355   : > { %5876 = vst.msk [vmem:[%s8581_s30 + $0x308] sm:$0xff] %vm547_vm1, %v5200_v30  ;;  %5913 = vst.msk [vmem:[%s8581_s30 + $0x430] sm:$0xff] %vm547_vm1, %v5274_v17  ;;  %v5275_v53 = vadd.f32 %v9133_v50, %v6828_v42  ;;  %v4943_v2 = vpop.f32.mrb[63].mxu0 }
 0x356   : > { %5911 = vst.msk [vmem:[%s8581_s30 + $0x420] sm:$0xff] %vm547_vm1, %v5272_v44  ;;  %v5273_v33 = vadd.f32 %v9133_v50, %v4943_v2 }
 0x357   : > { %5914 = vst.msk [vmem:[%s8581_s30 + $0x438] sm:$0xff] %vm547_vm1, %v5275_v53  ;;  %v6755_v9 = vpop.f32.mrb[64].mxu1 }
 0x358   : > { %5912 = vst.msk [vmem:[%s8581_s30 + $0x428] sm:$0xff] %vm547_vm1, %v5273_v33  ;;  %v5205_v20 = vadd.f32 %v9133_v50, %v6755_v9  ;;  %v4424_v29 = vpop.f32.mrb[65].mxu1 }
 0x359   : > { %v5203_v34 = vadd.f32 %v9133_v50, %v4424_v29  ;;  %v6756_v4 = vpop.f32.mrb[66].mxu1 }
 0x35a   : > { %5881 = vst.msk [vmem:[%s8581_s30 + $0x330] sm:$0xff] %vm547_vm1, %v5205_v20  ;;  %v5206_v19 = vadd.f32 %v9133_v50, %v6756_v4  ;;  %v4427_v7 = vpop.f32.mrb[67].mxu1  ;;  %v6831_v23 = vpop.f32.mrb[64].mxu0 }
 0x35b   : > { %5879 = vst.msk [vmem:[%s8581_s30 + $0x320] sm:$0xff] %vm547_vm1, %v5203_v34  ;;  %v5204_v58 = vadd.f32 %v9133_v50, %v4427_v7  ;;  %v5278_v5 = vadd.f32 %v9133_v50, %v6831_v23  ;;  %v4956_v26 = vpop.f32.mrb[65].mxu0 }
 0x35c   : > { %5882 = vst.msk [vmem:[%s8581_s30 + $0x338] sm:$0xff] %vm547_vm1, %v5206_v19  ;;  %v5276_v55 = vadd.f32 %v9133_v50, %v4956_v26  ;;  %v6832_v49 = vpop.f32.mrb[66].mxu0 }
 0x35d   : > { %5880 = vst.msk [vmem:[%s8581_s30 + $0x328] sm:$0xff] %vm547_vm1, %v5204_v58  ;;  %5917 = vst.msk [vmem:[%s8581_s30 + $0x450] sm:$0xff] %vm547_vm1, %v5278_v5  ;;  %v5279_v47 = vadd.f32 %v9133_v50, %v6832_v49  ;;  %v4959_v57 = vpop.f32.mrb[67].mxu0 }
 0x35e   : > { %5915 = vst.msk [vmem:[%s8581_s30 + $0x440] sm:$0xff] %vm547_vm1, %v5276_v55  ;;  %v5277_v18 = vadd.f32 %v9133_v50, %v4959_v57 }
 0x35f   : > { %5918 = vst.msk [vmem:[%s8581_s30 + $0x458] sm:$0xff] %vm547_vm1, %v5279_v47  ;;  %v6759_v12 = vpop.f32.mrb[68].mxu1 }
 0x360   : > { %5916 = vst.msk [vmem:[%s8581_s30 + $0x448] sm:$0xff] %vm547_vm1, %v5277_v18  ;;  %v5209_v45 = vadd.f32 %v9133_v50, %v6759_v12  ;;  %v4440_v24 = vpop.f32.mrb[69].mxu1 }
 0x361   : > { %v5207_v56 = vadd.f32 %v9133_v50, %v4440_v24  ;;  %v6760_v41 = vpop.f32.mrb[70].mxu1 }
 0x362   : > { %5885 = vst.msk [vmem:[%s8581_s30 + $0x350] sm:$0xff] %vm547_vm1, %v5209_v45  ;;  %v5210_v32 = vadd.f32 %v9133_v50, %v6760_v41  ;;  %v4443_v43 = vpop.f32.mrb[71].mxu1  ;;  %v6835_v46 = vpop.f32.mrb[68].mxu0 }
 0x363   : > { %5883 = vst.msk [vmem:[%s8581_s30 + $0x340] sm:$0xff] %vm547_vm1, %v5207_v56  ;;  %v5208_v37 = vadd.f32 %v9133_v50, %v4443_v43  ;;  %v5282_v51 = vadd.f32 %v9133_v50, %v6835_v46  ;;  %v4972_v6 = vpop.f32.mrb[69].mxu0 }
 0x364   : > { %5886 = vst.msk [vmem:[%s8581_s30 + $0x358] sm:$0xff] %vm547_vm1, %v5210_v32  ;;  %v5280_v10 = vadd.f32 %v9133_v50, %v4972_v6  ;;  %v6836_v3 = vpop.f32.mrb[70].mxu0 }
 0x365   : > { %5884 = vst.msk [vmem:[%s8581_s30 + $0x348] sm:$0xff] %vm547_vm1, %v5208_v37  ;;  %5921 = vst.msk [vmem:[%s8581_s30 + $0x470] sm:$0xff] %vm547_vm1, %v5282_v51  ;;  %v5283_v38 = vadd.f32 %v9133_v50, %v6836_v3  ;;  %v4975_v59 = vpop.f32.mrb[71].mxu0 }
 0x366   : > { %5919 = vst.msk [vmem:[%s8581_s30 + $0x460] sm:$0xff] %vm547_vm1, %v5280_v10  ;;  %v5281_v22 = vadd.f32 %v9133_v50, %v4975_v59 }
 0x367   : > { %5922 = vst.msk [vmem:[%s8581_s30 + $0x478] sm:$0xff] %vm547_vm1, %v5283_v38 }
 0x368   : > { %5920 = vst.msk [vmem:[%s8581_s30 + $0x468] sm:$0xff] %vm547_vm1, %v5281_v22 }
 0x369 PF: > { %s15_s14 = sadd.s32 1, %s7482_s14   ;;  %s9338_s12 = smov %s7478_s13 }
 0x36a   : > { %p12_p6 = scmp.ge.s32.totalorder %s15_s14, 4   ;;  %s9339_s13 = smov %s9341_s16 }
 0x36c   :  { %14 = sbr.rel (!%p12_p6) target bundleno = 3 (0x3), region = 91 }
 0x373   :  { %5356 = vsyncpa [#allocation3], 1 }
 0x374   :  { %5358 = vsyncpa [#allocation3 + $0x1], 1 }
 0x375   :  { %5359 = vsyncpa [#allocation5], 1 }

</bundles_post_ra>
